<compile_context>
chip_gen: v7x
topology: tpu7x:2x2x1
jax: 0.10.0
libtpu: 0.0.40
codegen_flags: <defaults>
</compile_context>

<pallas_src>
import functools

import jax
import jax.numpy as jnp
from jax.experimental import pallas as pl
from jax.experimental.pallas import tpu as pltpu


def _self_attention_kernel(x_ref, wqkv_ref, bqkv_ref, wout_ref, bout_ref,
                           o_ref, *, n_head):
    # x_ref   : (1, C, S)  input, channels on sublanes, flattened spatial on lanes
    # wqkv_ref: (3C, C)    qkv 1x1-conv weight
    # bqkv_ref: (3C, 1)    qkv bias
    # wout_ref: (C, C)     out-proj 1x1-conv weight
    # bout_ref: (C, 1)     out-proj bias
    # o_ref   : (1, C, S)  residual output
    x = x_ref[0].astype(jnp.float32)                     # (C, S)
    wqkv = wqkv_ref[...].astype(jnp.float32)             # (3C, C)
    bqkv = bqkv_ref[...].astype(jnp.float32)             # (3C, 1)
    wout = wout_ref[...].astype(jnp.float32)             # (C, C)
    bout = bout_ref[...].astype(jnp.float32)             # (C, 1)

    C, S = x.shape
    d = C // n_head
    # (d^-0.25 on q) * (d^-0.25 on k) == d^-0.5 applied once to q.
    scale2 = float(d) ** -0.5

    # qkv projection: one MXU matmul over channels for all pixels.
    qkv = jnp.dot(wqkv, x, preferred_element_type=jnp.float32) + bqkv  # (3C, S)

    y_heads = []
    for h in range(n_head):          # n_head is static & small -> unrolled
        qh = qkv[h * d:(h + 1) * d] * scale2                  # (d, S)
        kh = qkv[C + h * d:C + (h + 1) * d]                   # (d, S)
        vh = qkv[2 * C + h * d:2 * C + (h + 1) * d]           # (d, S)

        # logits[i, j] = sum_c qh[c, i] * kh[c, j]  -> (S, S), lane-dense
        logits = jax.lax.dot_general(
            qh, kh, (((0,), (0,)), ((), ())),
            preferred_element_type=jnp.float32)

        # numerically-stable softmax over key positions (last axis)
        logits = logits - jnp.max(logits, axis=-1, keepdims=True)
        p = jnp.exp(logits)                                   # (S, S)
        inv_l = 1.0 / jnp.sum(p, axis=-1, keepdims=True)      # (S, 1)
        att = p * inv_l                                       # lane-broadcast mul

        # yh[c, i] = sum_j vh[c, j] * att[i, j]     -> (d, S)
        yh = jax.lax.dot_general(
            vh, att, (((1,), (1,)), ((), ())),
            preferred_element_type=jnp.float32)
        y_heads.append(yh)

    y = y_heads[0] if n_head == 1 else jnp.concatenate(y_heads, axis=0)  # (C, S)

    # out projection + residual, written once, lane-dense.
    out = x + jnp.dot(wout, y, preferred_element_type=jnp.float32) + bout
    o_ref[0] = out.astype(o_ref.dtype)


def self_attention_2d(x_nchw, w_qkv, b_qkv, w_out, b_out, n_head=1):
    """x_nchw: (N, C, H, W); w_qkv: (3C, C, 1, 1); b_qkv: (3C,);
    w_out: (C, C, 1, 1); b_out: (C,). Returns (N, C, H, W)."""
    N, C, H, W = x_nchw.shape
    assert C % n_head == 0
    S = H * W

    # Free re-layouts only (contiguous reshapes) -- no transpose, no pad.
    x_flat = x_nchw.reshape(N, C, S)
    wqkv2d = w_qkv.reshape(3 * C, C)
    wout2d = w_out.reshape(C, C)
    bqkv2d = b_qkv.reshape(3 * C, 1)
    bout2d = b_out.reshape(C, 1)

    kernel = functools.partial(_self_attention_kernel, n_head=n_head)

    out_flat = pl.pallas_call(
        kernel,
        out_shape=jax.ShapeDtypeStruct((N, C, S), x_nchw.dtype),
        grid_spec=pltpu.PrefetchScalarGridSpec(
            num_scalar_prefetch=0,
            grid=(N,),
            in_specs=[
                pl.BlockSpec((1, C, S), lambda b: (b, 0, 0)),
                pl.BlockSpec((3 * C, C), lambda b: (0, 0)),
                pl.BlockSpec((3 * C, 1), lambda b: (0, 0)),
                pl.BlockSpec((C, C), lambda b: (0, 0)),
                pl.BlockSpec((C, 1), lambda b: (0, 0)),
            ],
            out_specs=pl.BlockSpec((1, C, S), lambda b: (b, 0, 0)),
        ),
        compiler_params=pltpu.CompilerParams(
            dimension_semantics=("parallel",)),
    )(x_flat, wqkv2d, bqkv2d, wout2d, bout2d)

    return out_flat.reshape(N, C, H, W)


def _reference(x, w_qkv, b_qkv, w_out, b_out, n_head):
    """Pure-JAX replica of the PyTorch SelfAttention2d.forward."""
    N, C, H, W = x.shape
    S = H * W
    d = C // n_head
    hp = jax.lax.Precision.HIGHEST

    xf = x.reshape(N, C, S).astype(jnp.float32)
    qkv = jnp.einsum("ncs,oc->nos", xf, w_qkv.reshape(3 * C, C).astype(jnp.float32),
                     precision=hp) + b_qkv.reshape(1, 3 * C, 1)
    qkv = qkv.reshape(N, 3 * n_head, d, S).transpose(0, 1, 3, 2)   # (N, 3h, S, d)
    q, k, v = jnp.split(qkv, 3, axis=1)
    scale = d ** -0.25
    att = jnp.einsum("nhid,nhjd->nhij", q * scale, k * scale, precision=hp)
    att = jax.nn.softmax(att, axis=-1)
    y = jnp.einsum("nhij,nhjd->nhid", att, v, precision=hp)        # (N, h, S, d)
    y = y.transpose(0, 1, 3, 2).reshape(N, C, S)
    out = xf + jnp.einsum("ncs,oc->nos", y,
                          w_out.reshape(C, C).astype(jnp.float32),
                          precision=hp) + b_out.reshape(1, C, 1)
    return out.reshape(N, C, H, W).astype(x.dtype)


if __name__ == "__main__":
    key = jax.random.PRNGKey(0)
    kx, k1, k2, k3, k4 = jax.random.split(key, 5)

    B, C, H, W = 2, 4, 16, 16
    n_head = 1

    x = jax.random.normal(kx, (B, C, H, W), dtype=jnp.float32)
    w_qkv = jax.random.normal(k1, (3 * C, C, 1, 1), dtype=jnp.float32) * 0.1
    b_qkv = jax.random.normal(k2, (3 * C,), dtype=jnp.float32) * 0.1
    w_out = jax.random.normal(k3, (C, C, 1, 1), dtype=jnp.float32) * 0.1
    b_out = jax.random.normal(k4, (C,), dtype=jnp.float32) * 0.1

    out = self_attention_2d(x, w_qkv, b_qkv, w_out, b_out, n_head=n_head)
    out = jax.block_until_ready(out)

    ref = _reference(x, w_qkv, b_qkv, w_out, b_out, n_head)
    assert out.shape == (B, C, H, W), out.shape
    assert jnp.allclose(out, ref, atol=1e-4, rtol=1e-4), \
        float(jnp.max(jnp.abs(out - ref)))

    print("KERNEL_OK")
</pallas_src>

<mosaic_0001>
module attributes {stable_mosaic.version = 11 : i64} {
  func.func @_self_attention_kernel(%arg0: i32, %arg1: memref<1x4x256xf32, #tpu.memory_space<vmem>>, %arg2: memref<12x4xf32, #tpu.memory_space<vmem>>, %arg3: memref<12x1xf32, #tpu.memory_space<vmem>>, %arg4: memref<4x4xf32, #tpu.memory_space<vmem>>, %arg5: memref<4x1xf32, #tpu.memory_space<vmem>>, %arg6: memref<1x4x256xf32, #tpu.memory_space<vmem>>) attributes {dimension_semantics = [#tpu.dimension_semantics<parallel>], iteration_bounds = array<i64: 2>, scalar_prefetch = 0 : i64, scratch_operands = 0 : i64, tpu.core_type = #tpu.core_type<tc>, window_params = [{transform_indices = @transform_0, window_bounds = array<i64: 1, 4, 256>}, {pipeline_mode = #tpu.pipeline_mode<synchronous>, transform_indices = @transform_1, window_bounds = array<i64: 12, 4>}, {pipeline_mode = #tpu.pipeline_mode<synchronous>, transform_indices = @transform_2, window_bounds = array<i64: 12, 1>}, {pipeline_mode = #tpu.pipeline_mode<synchronous>, transform_indices = @transform_3, window_bounds = array<i64: 4, 4>}, {pipeline_mode = #tpu.pipeline_mode<synchronous>, transform_indices = @transform_4, window_bounds = array<i64: 4, 1>}, {transform_indices = @transform_5, window_bounds = array<i64: 1, 4, 256>}]} {
    %c0 = arith.constant 0 : index
    %c0_0 = arith.constant 0 : index
    %c0_1 = arith.constant 0 : index
    %0 = vector.load %arg1[%c0, %c0_0, %c0_1] : memref<1x4x256xf32, #tpu.memory_space<vmem>>, vector<1x4x256xf32>
    %1 = vector.shape_cast %0 : vector<1x4x256xf32> to vector<4x256xf32>
    %c0_2 = arith.constant 0 : index
    %c0_3 = arith.constant 0 : index
    %2 = vector.load %arg2[%c0_2, %c0_3] : memref<12x4xf32, #tpu.memory_space<vmem>>, vector<12x4xf32>
    %c0_4 = arith.constant 0 : index
    %c0_5 = arith.constant 0 : index
    %3 = vector.load %arg3[%c0_4, %c0_5] : memref<12x1xf32, #tpu.memory_space<vmem>>, vector<12x1xf32>
    %c0_6 = arith.constant 0 : index
    %c0_7 = arith.constant 0 : index
    %4 = vector.load %arg4[%c0_6, %c0_7] : memref<4x4xf32, #tpu.memory_space<vmem>>, vector<4x4xf32>
    %c0_8 = arith.constant 0 : index
    %c0_9 = arith.constant 0 : index
    %5 = vector.load %arg5[%c0_8, %c0_9] : memref<4x1xf32, #tpu.memory_space<vmem>>, vector<4x1xf32>
    %cst = arith.constant dense<0.000000e+00> : vector<12x256xf32>
    %6 = tpu.matmul %2, %1, %cst {dimension_numbers = #tpu.dot_dimension_numbers<[1], [0], [0], [1], [0, 0, 1, 1], [], []>} : vector<12x4xf32>, vector<4x256xf32>, vector<12x256xf32> -> vector<12x256xf32>
    %7 = vector.broadcast %3 : vector<12x1xf32> to vector<12x256xf32>
    %8 = arith.addf %6, %7 : vector<12x256xf32>
    %9 = vector.extract_strided_slice %8 {offsets = [0, 0], sizes = [4, 256], strides = [1, 1]} : vector<12x256xf32> to vector<4x256xf32>
    %cst_10 = arith.constant 5.000000e-01 : f32
    %10 = vector.broadcast %cst_10 : f32 to vector<4x256xf32>
    %11 = arith.mulf %9, %10 : vector<4x256xf32>
    %12 = vector.extract_strided_slice %8 {offsets = [4, 0], sizes = [4, 256], strides = [1, 1]} : vector<12x256xf32> to vector<4x256xf32>
    %13 = vector.extract_strided_slice %8 {offsets = [8, 0], sizes = [4, 256], strides = [1, 1]} : vector<12x256xf32> to vector<4x256xf32>
    %cst_11 = arith.constant dense<0.000000e+00> : vector<256x256xf32>
    %14 = tpu.matmul %11, %12, %cst_11 {dimension_numbers = #tpu.dot_dimension_numbers<[0], [0], [1], [1], [0, 1, 1, 1], [], []>} : vector<4x256xf32>, vector<4x256xf32>, vector<256x256xf32> -> vector<256x256xf32>
    %cst_12 = arith.constant dense<0xFF800000> : vector<256xf32>
    %15 = vector.multi_reduction <maximumf>, %14, %cst_12 [1] : vector<256x256xf32> to vector<256xf32>
    %16 = vector.shape_cast %15 : vector<256xf32> to vector<256x1xf32>
    %17 = vector.broadcast %16 : vector<256x1xf32> to vector<256x256xf32>
    %18 = arith.subf %14, %17 : vector<256x256xf32>
    %19 = math.exp %18 : vector<256x256xf32>
    %cst_13 = arith.constant dense<0.000000e+00> : vector<256xf32>
    %20 = vector.multi_reduction <add>, %19, %cst_13 [1] : vector<256x256xf32> to vector<256xf32>
    %21 = vector.shape_cast %20 : vector<256xf32> to vector<256x1xf32>
    %cst_14 = arith.constant 1.000000e+00 : f32
    %22 = vector.broadcast %cst_14 : f32 to vector<256x1xf32>
    %23 = arith.divf %22, %21 : vector<256x1xf32>
    %24 = vector.broadcast %23 : vector<256x1xf32> to vector<256x256xf32>
    %25 = arith.mulf %19, %24 : vector<256x256xf32>
    %cst_15 = arith.constant dense<0.000000e+00> : vector<4x256xf32>
    %26 = tpu.matmul %13, %25, %cst_15 {dimension_numbers = #tpu.dot_dimension_numbers<[1], [1], [0], [0], [0, 0, 1, 0], [], []>} : vector<4x256xf32>, vector<256x256xf32>, vector<4x256xf32> -> vector<4x256xf32>
    %cst_16 = arith.constant dense<0.000000e+00> : vector<4x256xf32>
    %27 = tpu.matmul %4, %26, %cst_16 {dimension_numbers = #tpu.dot_dimension_numbers<[1], [0], [0], [1], [0, 0, 1, 1], [], []>} : vector<4x4xf32>, vector<4x256xf32>, vector<4x256xf32> -> vector<4x256xf32>
    %28 = arith.addf %1, %27 : vector<4x256xf32>
    %29 = vector.broadcast %5 : vector<4x1xf32> to vector<4x256xf32>
    %30 = arith.addf %28, %29 : vector<4x256xf32>
    %c0_17 = arith.constant 0 : index
    %c0_18 = arith.constant 0 : index
    %c0_19 = arith.constant 0 : index
    %31 = vector.load %arg6[%c0_17, %c0_18, %c0_19] : memref<1x4x256xf32, #tpu.memory_space<vmem>>, vector<1x4x256xf32>
    %32 = vector.shape_cast %31 : vector<1x4x256xf32> to vector<4x256xf32>
    %33 = vector.shape_cast %30 : vector<4x256xf32> to vector<1x4x256xf32>
    tpu.vector_store %arg6[%c0_17, %c0_18, %c0_19], %33 {strides = array<i32>} : memref<1x4x256xf32, #tpu.memory_space<vmem>>, vector<1x4x256xf32>,
    return
  }
  func.func @transform_0(%arg0: i32) -> (i32, i32, i32) {
    %c0_i32 = arith.constant 0 : i32
    %c0_i32_0 = arith.constant 0 : i32
    %c0_i32_1 = arith.constant 0 : i32
    return %arg0, %c0_i32, %c0_i32_0 : i32, i32, i32
  }
  func.func @transform_1(%arg0: i32) -> (i32, i32) {
    %c0_i32 = arith.constant 0 : i32
    %c0_i32_0 = arith.constant 0 : i32
    %c0_i32_1 = arith.constant 0 : i32
    return %c0_i32, %c0_i32_0 : i32, i32
  }
  func.func @transform_2(%arg0: i32) -> (i32, i32) {
    %c0_i32 = arith.constant 0 : i32
    %c0_i32_0 = arith.constant 0 : i32
    %c0_i32_1 = arith.constant 0 : i32
    return %c0_i32, %c0_i32_0 : i32, i32
  }
  func.func @transform_3(%arg0: i32) -> (i32, i32) {
    %c0_i32 = arith.constant 0 : i32
    %c0_i32_0 = arith.constant 0 : i32
    %c0_i32_1 = arith.constant 0 : i32
    return %c0_i32, %c0_i32_0 : i32, i32
  }
  func.func @transform_4(%arg0: i32) -> (i32, i32) {
    %c0_i32 = arith.constant 0 : i32
    %c0_i32_0 = arith.constant 0 : i32
    %c0_i32_1 = arith.constant 0 : i32
    return %c0_i32, %c0_i32_0 : i32, i32
  }
  func.func @transform_5(%arg0: i32) -> (i32, i32, i32) {
    %c0_i32 = arith.constant 0 : i32
    %c0_i32_0 = arith.constant 0 : i32
    %c0_i32_1 = arith.constant 0 : i32
    return %arg0, %c0_i32, %c0_i32_0 : i32, i32, i32
  }
}

</mosaic_0001>

<bundles_post_ra>
// kernel: tpu_custom_call.1
= control target key start
LH: loop header
LB: loop body
LE: loop exit
PB: predicated region body
PF: predicated region fallthrough
CT: control target
= control target key end

     0   :  { %10 = vsyncpa [#allocation3], 0  ;;  %s2709_s0 = inlined_call_operand.vmem [shape: f32[2,4,256], index: 0, kind: input, shape index: {}]   ;;  %s2710_s1 = inlined_call_operand.vmem [shape: f32[12,4], index: 1, kind: input, shape index: {}]   ;;  %s2711_s2 = inlined_call_operand.vmem [shape: f32[12,1], index: 2, kind: input, shape index: {}]   ;;  %s2712_s3 = inlined_call_operand.vmem [shape: f32[4,4], index: 3, kind: input, shape index: {}]   ;;  %s2713_s4 = inlined_call_operand.vmem [shape: f32[4,1], index: 4, kind: input, shape index: {}]   ;;  %s2714_s5 = inlined_call_operand.hbm [shape: f32[2,4,256], index: 5, kind: output, shape index: {}]  }
   0x1   :  { %12 = vsyncpa [#allocation3 + $0x1], 0  ;;  %s1969_s18 = smov 0   ;;  %s1971_s19 = smov 0  }
   0x2   :  { %s1973_s20 = smov 0   ;;  %s1975_s21 = smov 0  }
   0x3 LB: > { %s1990_s22 = sadd.s32 4294967295, %s1933_s21   ;;  %s1514_s23 = sadd.s32 4294967294, %s1933_s21   ;;  %s1933_s21 = sphi %s1975_s21, %s2812_s21   ;;  %s1929_s20 = sphi %s1973_s20, %s2811_s20   ;;  %s1925_s19 = sphi %s1971_s19, %s2810_s19   ;;  %s1921_s18 = sphi %s1969_s18, %s2809_s18  }
   0x4   : > { %s1994_s24 = sadd.s32 1, %s1933_s21   ;;  %s135_s25 = sadd.s32 1, %s1929_s20 }
   0x5   : > { %s132_s26 = ssub.s32 %s1933_s21, %s1994_s24  ;;  %p145_p0 = scmp.ne.s32.totalorder %s1929_s20, %s1925_s19 }
   0x6   : > { %p133_p1 = scmp.eq.s32.totalorder %s132_s26, 0  ;;  %p146_p2 = scmp.eq.s32.totalorder %s1990_s22, 1 }
   0x7   : > { %p151_p3 = scmp.ne.s32.totalorder %s1925_s19, %s1921_s18  ;;  %p152_p4 = scmp.eq.s32.totalorder %s1514_s23, 1 }
   0x8   : > { %s2005_s27 = scalar_select %p133_p1, %s1929_s20, %s135_s25  }
   0x9   : > { %p2007_p5 = por %p146_p2, %p145_p0  ;;  %p2011_p6 = por %p152_p4, %p151_p3 }
   0xa   : > { %p1517_p7 = scmp.ge.s32.totalorder %s1933_s21, 1  ;;  %p190_p8 = scmp.lt.s32.totalorder %s1933_s21, 3 }
   0xc   : > { %p191_p9 = pnand %p1517_p7, %p190_p8 }
   0xe   : > { %194 = sbr.rel (%p191_p9) target bundleno = 1558 (0x616), region = 40 }
  0x15   : > { %p218_p10 = scmp.lt.s32.totalorder %s1990_s22, 1  ;;  %v1935_v0 = vmov 0.0   ;;  %v1936_v1 = vmov 0   ;;  %v226_v2 = vld [vmem:[%s2711_s2] sm:$0xff]  ;;  %vm249_vm0 = vcmask 1043456   ;;  %vm242_vm1 = vcmask 31744  }
  0x16   : > { %318 = vmatprep.mubr.f32.mxu0 %v1935_v0  ;;  %1675 = vset.pattern.permute.xlu0 %v1936_v1  ;;  %v224_v5 = vld [vmem:[%s2710_s1] sm:$0xff]  ;;  %s215_s6 = sand.u32 1, %s1925_s19  }
  0x17   : > { %s219_s7 = scalar_select %p218_p10, %s1990_s22, 1  ;;  %232 = vperm.xlu0 %1675, %v226_v2   ;;  %565 = vmatprep.mubr.f32.mxu1 %v1935_v0 }
  0x18   : > { %s1441_s15 = scalar_lea.sflag [#allocation3], %s215_s6 }
  0x19   : > { %s1567_s8 = sshll.u32 %s219_s7, 3  ;;  %s1518_s7 = sshll.u32 %s215_s6, 3 }
  0x1a   : > { %s2027_s11 = scalar_lea.vmem %s2709_s0, %s1567_s8  ;;  %s1568_s8 = sshll.u32 %s1990_s22, 7 }
  0x1b   : > { %v223_v3 = vld [vmem:[%s2027_s11] sm:$0xff]  ;;  %s217_s9 = scalar_lea.vmem [#allocation2], %s1518_s7  ;;  %s2667_s14 = scalar_lea.hbm %s2714_s5, %s1568_s8 }
  0x1c   : > { %v241_v4 = vcombine.high %v223_v3, %v223_v3  ;;  %s1455_s10 = sshll.u32 %s217_s9, 4  ;;  %s1938_s22 = smov [#allocation2]   ;;  %s2669_s10 = int_to_ptr.vmem [resolvable:$true] %s1455_s10 }
  0x1d   : > { %s1871_s16 = scalar_lea.vmem %s2669_s10, 128 }
  0x1e   : > { %1521 = vmatprep.subr.msk.mxu0 %vm249_vm0, %v241_v4  ;;  %p1872_p11 = scmp.ne.s32.totalorder %s2669_s10, %s1871_s16 }
  0x1f   : > { %1522 = vmatpush1.msk.msra.mxu0 %vm249_vm0, %v223_v3 }
  0x20   : > { %1523 = vmatmul.mubr.msk.f32.vlgmr.msra.gmra.mrb[0].mxu0 %vm242_vm1, %v224_v5  ;;  %p1873_p12 = pnand %p1872_p11, %p2007_p5 }
  0x21   : > { %324 = vmatprep.mubr.f32.mxu0 %v1935_v0 }
  0x22   : > { %p1874_p13 = pneg %p1873_p12 }
  0x96   : > { %v233_v6 = vpop.permute.xlu0 %232 }
  0xf3   : > { %v320_v7 = vpop.f32.mrb[0].mxu0 }
  0xf4   : > { %v321_v8 = vadd.f32 %v320_v7, %v233_v6  ;;  %v322_v9 = vpop.f32.mrb[1].mxu0 }
  0xf5   : > { %v323_v10 = vadd.f32 %v322_v9, %v233_v6 }
  0xf6   : > { %v331_v11 = vmul.f32 0.5, %v321_v8  ;;  %v399_v14 = vrot.slane %v321_v8, 4 }
  0xf7   : > { %v400_v12 = vrot.slane %v323_v10, 4  ;;  %v332_v13 = vmul.f32 0.5, %v323_v10 }
  0xf8   : > { %333 = vxpose.xlu0.b32.start.end [1/1] (short) %v331_v11, 128 }
  0xf9   : > { %1525 = vmatprep.subr.msk.mxu1 %vm249_vm0, %v400_v12  ;;  %365 = vxpose.xlu1.b32.start.end [1/1] (short) %v332_v13, 128 }
  0xfa   : > { %1526 = vmatpush1.msk.msra.mxu1 %vm249_vm0, %v399_v14 }
 0x117   : > { %1676 = vset.pattern.permute.xlu1 %v1936_v1 }
 0x178   : > { %v349_v15 = vpop.trf.xlu0 }
 0x179   : > { %1527 = vmatmul.mubr.msk.f32.vlgmr.msra.gmra.mrb[0].mxu1 %vm242_vm1, %v349_v15  ;;  %v381_v24 = vpop.trf.xlu1 }
 0x17a   : > { %571 = vmatprep.mubr.f32.mxu1 %v1935_v0 }
 0x17c   : > { %v350_v16 = vpop.trf.xlu0 }
 0x17d   : > { %1528 = vmatmul.mubr.msk.f32.gmra.mrb[2].mxu1 %vm242_vm1, %v350_v16  ;;  %v382_v27 = vpop.trf.xlu1 }
 0x17e   : > { %577 = vmatprep.mubr.f32.mxu1 %v1935_v0 }
 0x180   : > { %v351_v17 = vpop.trf.xlu0 }
 0x181   : > { %1529 = vmatmul.mubr.msk.f32.gmra.mrb[4].mxu1 %vm242_vm1, %v351_v17  ;;  %v383_v29 = vpop.trf.xlu1 }
 0x182   : > { %583 = vmatprep.mubr.f32.mxu1 %v1935_v0 }
 0x184   : > { %v352_v18 = vpop.trf.xlu0 }
 0x185   : > { %1530 = vmatmul.mubr.msk.f32.gmra.mrb[6].mxu1 %vm242_vm1, %v352_v18  ;;  %v384_v32 = vpop.trf.xlu1 }
 0x186   : > { %589 = vmatprep.mubr.f32.mxu1 %v1935_v0 }
 0x188   : > { %v353_v19 = vpop.trf.xlu0 }
 0x189   : > { %1531 = vmatmul.mubr.msk.f32.gmra.mrb[8].mxu1 %vm242_vm1, %v353_v19  ;;  %v385_v34 = vpop.trf.xlu1 }
 0x18a   : > { %595 = vmatprep.mubr.f32.mxu1 %v1935_v0 }
 0x18c   : > { %v354_v20 = vpop.trf.xlu0 }
 0x18d   : > { %1532 = vmatmul.mubr.msk.f32.gmra.mrb[10].mxu1 %vm242_vm1, %v354_v20  ;;  %v386_v36 = vpop.trf.xlu1 }
 0x18e   : > { %601 = vmatprep.mubr.f32.mxu1 %v1935_v0 }
 0x190   : > { %v355_v21 = vpop.trf.xlu0 }
 0x191   : > { %1533 = vmatmul.mubr.msk.f32.gmra.mrb[12].mxu1 %vm242_vm1, %v355_v21  ;;  %v387_v37 = vpop.trf.xlu1 }
 0x192   : > { %607 = vmatprep.mubr.f32.mxu1 %v1935_v0 }
 0x194   : > { %v356_v22 = vpop.trf.xlu0 }
 0x195   : > { %1534 = vmatmul.mubr.msk.f32.gmra.mrb[14].mxu1 %vm242_vm1, %v356_v22  ;;  %v388_v38 = vpop.trf.xlu1 }
 0x196   : > { %613 = vmatprep.mubr.f32.mxu1 %v1935_v0 }
 0x198   : > { %v357_v23 = vpop.trf.xlu0 }
 0x199   : > { %1535 = vmatmul.mubr.msk.f32.gmra.mrb[16].mxu1 %vm242_vm1, %v357_v23  ;;  %v389_v39 = vpop.trf.xlu1 }
 0x19a   : > { %619 = vmatprep.mubr.f32.mxu1 %v1935_v0 }
 0x19c   : > { %v358_v25 = vpop.trf.xlu0 }
 0x19d   : > { %1536 = vmatmul.mubr.msk.f32.gmra.mrb[18].mxu1 %vm242_vm1, %v358_v25  ;;  %v390_v40 = vpop.trf.xlu1 }
 0x19e   : > { %625 = vmatprep.mubr.f32.mxu1 %v1935_v0 }
 0x1a0   : > { %v359_v26 = vpop.trf.xlu0 }
 0x1a1   : > { %1537 = vmatmul.mubr.msk.f32.gmra.mrb[20].mxu1 %vm242_vm1, %v359_v26  ;;  %v391_v41 = vpop.trf.xlu1 }
 0x1a2   : > { %631 = vmatprep.mubr.f32.mxu1 %v1935_v0 }
 0x1a4   : > { %v360_v28 = vpop.trf.xlu0 }
 0x1a5   : > { %1538 = vmatmul.mubr.msk.f32.gmra.mrb[22].mxu1 %vm242_vm1, %v360_v28  ;;  %v392_v42 = vpop.trf.xlu1 }
 0x1a6   : > { %637 = vmatprep.mubr.f32.mxu1 %v1935_v0 }
 0x1a8   : > { %v361_v30 = vpop.trf.xlu0 }
 0x1a9   : > { %1539 = vmatmul.mubr.msk.f32.gmra.mrb[24].mxu1 %vm242_vm1, %v361_v30  ;;  %v393_v43 = vpop.trf.xlu1 }
 0x1aa   : > { %643 = vmatprep.mubr.f32.mxu1 %v1935_v0 }
 0x1ac   : > { %v362_v31 = vpop.trf.xlu0 }
 0x1ad   : > { %1540 = vmatmul.mubr.msk.f32.gmra.mrb[26].mxu1 %vm242_vm1, %v362_v31  ;;  %v394_v44 = vpop.trf.xlu1 }
 0x1ae   : > { %649 = vmatprep.mubr.f32.mxu1 %v1935_v0 }
 0x1b0   : > { %v363_v33 = vpop.trf.xlu0 }
 0x1b1   : > { %1541 = vmatmul.mubr.msk.f32.gmra.mrb[28].mxu1 %vm242_vm1, %v363_v33  ;;  %v395_v45 = vpop.trf.xlu1 }
 0x1b2   : > { %655 = vmatprep.mubr.f32.mxu1 %v1935_v0 }
 0x1b4   : > { %v364_v35 = vpop.trf.xlu0 }
 0x1b5   : > { %1542 = vmatmul.mubr.msk.f32.gmra.mrb[30].mxu1 %vm242_vm1, %v364_v35  ;;  %v396_v46 = vpop.trf.xlu1 }
 0x1b6   : > { %661 = vmatprep.mubr.f32.mxu1 %v1935_v0 }
 0x1b9   : > { %1543 = vmatmul.mubr.msk.f32.gmra.mrb[32].mxu1 %vm242_vm1, %v381_v24 }
 0x1ba   : > { %667 = vmatprep.mubr.f32.mxu1 %v1935_v0 }
 0x1bd   : > { %1544 = vmatmul.mubr.msk.f32.gmra.mrb[34].mxu1 %vm242_vm1, %v382_v27 }
 0x1be   : > { %673 = vmatprep.mubr.f32.mxu1 %v1935_v0 }
 0x1c1   : > { %1545 = vmatmul.mubr.msk.f32.gmra.mrb[36].mxu1 %vm242_vm1, %v383_v29 }
 0x1c2   : > { %679 = vmatprep.mubr.f32.mxu1 %v1935_v0 }
 0x1c5   : > { %1546 = vmatmul.mubr.msk.f32.gmra.mrb[38].mxu1 %vm242_vm1, %v384_v32 }
 0x1c6   : > { %685 = vmatprep.mubr.f32.mxu1 %v1935_v0 }
 0x1c9   : > { %1547 = vmatmul.mubr.msk.f32.gmra.mrb[40].mxu1 %vm242_vm1, %v385_v34 }
 0x1ca   : > { %691 = vmatprep.mubr.f32.mxu1 %v1935_v0 }
 0x1cd   : > { %1548 = vmatmul.mubr.msk.f32.gmra.mrb[42].mxu1 %vm242_vm1, %v386_v36 }
 0x1ce   : > { %697 = vmatprep.mubr.f32.mxu1 %v1935_v0 }
 0x1d1   : > { %1549 = vmatmul.mubr.msk.f32.gmra.mrb[44].mxu1 %vm242_vm1, %v387_v37 }
 0x1d2   : > { %703 = vmatprep.mubr.f32.mxu1 %v1935_v0 }
 0x1d5   : > { %1550 = vmatmul.mubr.msk.f32.gmra.mrb[46].mxu1 %vm242_vm1, %v388_v38 }
 0x1d6   : > { %709 = vmatprep.mubr.f32.mxu1 %v1935_v0 }
 0x1d9   : > { %1551 = vmatmul.mubr.msk.f32.gmra.mrb[48].mxu1 %vm242_vm1, %v389_v39 }
 0x1da   : > { %715 = vmatprep.mubr.f32.mxu1 %v1935_v0 }
 0x1dd   : > { %1552 = vmatmul.mubr.msk.f32.gmra.mrb[50].mxu1 %vm242_vm1, %v390_v40 }
 0x1de   : > { %721 = vmatprep.mubr.f32.mxu1 %v1935_v0 }
 0x1e1   : > { %1553 = vmatmul.mubr.msk.f32.gmra.mrb[52].mxu1 %vm242_vm1, %v391_v41 }
 0x1e2   : > { %727 = vmatprep.mubr.f32.mxu1 %v1935_v0 }
 0x1e5   : > { %1554 = vmatmul.mubr.msk.f32.gmra.mrb[54].mxu1 %vm242_vm1, %v392_v42 }
 0x1e6   : > { %733 = vmatprep.mubr.f32.mxu1 %v1935_v0 }
 0x1e9   : > { %1555 = vmatmul.mubr.msk.f32.gmra.mrb[56].mxu1 %vm242_vm1, %v393_v43 }
 0x1ea   : > { %739 = vmatprep.mubr.f32.mxu1 %v1935_v0 }
 0x1ed   : > { %1556 = vmatmul.mubr.msk.f32.gmra.mrb[58].mxu1 %vm242_vm1, %v394_v44 }
 0x1ee   : > { %745 = vmatprep.mubr.f32.mxu1 %v1935_v0 }
 0x1f1   : > { %1557 = vmatmul.mubr.msk.f32.gmra.mrb[60].mxu1 %vm242_vm1, %v395_v45 }
 0x1f2   : > { %751 = vmatprep.mubr.f32.mxu1 %v1935_v0 }
 0x1f5   : > { %1558 = vmatmul.mubr.msk.f32.gmra.mrb[62].mxu1 %vm242_vm1, %v396_v46 }
 0x1f6   : > { %1414 = vmatprep.mubr.f32.mxu1 %v1935_v0 }
 0x24c   : > { %v2103_v47 = vpop.f32.mrb[0].mxu1 }
 0x24d   : > { %v2105_v48 = vpop.f32.mrb[1].mxu1 }
 0x24e   : > { %v758_v49 = vmax.f32 %v2103_v47, %v2105_v48 }
 0x250   : > { %759 = vmax.xlane.f32.xlu1 %v758_v49  ;;  %v2109_v50 = vpop.f32.mrb[2].mxu1 }
 0x251   : > { %v2111_v51 = vpop.f32.mrb[3].mxu1 }
 0x252   : > { %v761_v52 = vmax.f32 %v2109_v50, %v2111_v51 }
 0x254   : > { %762 = vmax.xlane.f32.xlu0 %v761_v52  ;;  %v2115_v53 = vpop.f32.mrb[4].mxu1 }
 0x255   : > { %v2117_v54 = vpop.f32.mrb[5].mxu1 }
 0x256   : > { %v764_v55 = vmax.f32 %v2115_v53, %v2117_v54 }
 0x258   : > { %765 = vmax.xlane.f32.xlu1 %v764_v55  ;;  %v2121_v56 = vpop.f32.mrb[6].mxu1 }
 0x259   : > { %v2123_v57 = vpop.f32.mrb[7].mxu1 }
 0x25a   : > { %v767_v58 = vmax.f32 %v2121_v56, %v2123_v57 }
 0x25c   : > { %768 = vmax.xlane.f32.xlu1 %v767_v58  ;;  %v2127_v59 = vpop.f32.mrb[8].mxu1 }
 0x25d   : > { %v2129_v60 = vpop.f32.mrb[9].mxu1 }
 0x25e   : > { %v770_v61 = vmax.f32 %v2127_v59, %v2129_v60 }
 0x260   : > { %771 = vmax.xlane.f32.xlu1 %v770_v61  ;;  %v2133_v62 = vpop.f32.mrb[10].mxu1 }
 0x261   : > { %v2135_v63 = vpop.f32.mrb[11].mxu1 }
 0x262   : > { %v773_v0 = vmax.f32 %v2133_v62, %v2135_v63 }
 0x264   : > { %774 = vmax.xlane.f32.xlu1 %v773_v0  ;;  %v2139_v1 = vpop.f32.mrb[12].mxu1 }
 0x265   : > { %v2141_v2 = vpop.f32.mrb[13].mxu1 }
 0x266   : > { %v776_v3 = vmax.f32 %v2139_v1, %v2141_v2 }
 0x268   : > { %777 = vmax.xlane.f32.xlu1 %v776_v3  ;;  %v2145_v4 = vpop.f32.mrb[14].mxu1 }
 0x269   : > { %v2147_v5 = vpop.f32.mrb[15].mxu1 }
 0x26a   : > { %v779_v6 = vmax.f32 %v2145_v4, %v2147_v5 }
 0x26c   : > { %780 = vmax.xlane.f32.xlu1 %v779_v6  ;;  %v2151_v7 = vpop.f32.mrb[16].mxu1 }
 0x26d   : > { %v2153_v8 = vpop.f32.mrb[17].mxu1 }
 0x26e   : > { %v782_v9 = vmax.f32 %v2151_v7, %v2153_v8 }
 0x270   : > { %783 = vmax.xlane.f32.xlu1 %v782_v9  ;;  %v2157_v10 = vpop.f32.mrb[18].mxu1 }
 0x271   : > { %v2159_v11 = vpop.f32.mrb[19].mxu1 }
 0x272   : > { %v785_v12 = vmax.f32 %v2157_v10, %v2159_v11 }
 0x274   : > { %786 = vmax.xlane.f32.xlu1 %v785_v12  ;;  %v2163_v13 = vpop.f32.mrb[20].mxu1 }
 0x275   : > { %v2165_v14 = vpop.f32.mrb[21].mxu1 }
 0x276   : > { %v788_v15 = vmax.f32 %v2163_v13, %v2165_v14 }
 0x278   : > { %789 = vmax.xlane.f32.xlu1 %v788_v15  ;;  %v2169_v16 = vpop.f32.mrb[22].mxu1 }
 0x279   : > { %v2171_v17 = vpop.f32.mrb[23].mxu1 }
 0x27a   : > { %v791_v18 = vmax.f32 %v2169_v16, %v2171_v17 }
 0x27c   : > { %792 = vmax.xlane.f32.xlu0 %v791_v18  ;;  %v2175_v19 = vpop.f32.mrb[24].mxu1 }
 0x27d   : > { %v2177_v20 = vpop.f32.mrb[25].mxu1 }
 0x27e   : > { %v794_v21 = vmax.f32 %v2175_v19, %v2177_v20 }
 0x280   : > { %795 = vmax.xlane.f32.xlu1 %v794_v21  ;;  %v2181_v22 = vpop.f32.mrb[26].mxu1 }
 0x281   : > { %v2183_v23 = vpop.f32.mrb[27].mxu1 }
 0x282   : > { %v797_v24 = vmax.f32 %v2181_v22, %v2183_v23 }
 0x284   : > { %798 = vmax.xlane.f32.xlu0 %v797_v24  ;;  %v2187_v25 = vpop.f32.mrb[28].mxu1 }
 0x285   : > { %v2189_v26 = vpop.f32.mrb[29].mxu1 }
 0x286   : > { %v800_v27 = vmax.f32 %v2187_v25, %v2189_v26 }
 0x288   : > { %801 = vmax.xlane.f32.xlu1 %v800_v27  ;;  %v2193_v28 = vpop.f32.mrb[30].mxu1 }
 0x289   : > { %v2195_v29 = vpop.f32.mrb[31].mxu1 }
 0x28a   : > { %v803_v30 = vmax.f32 %v2193_v28, %v2195_v29 }
 0x28c   : > { %804 = vmax.xlane.f32.xlu0 %v803_v30  ;;  %v2199_v31 = vpop.f32.mrb[32].mxu1 }
 0x28d   : > { %v2201_v32 = vpop.f32.mrb[33].mxu1 }
 0x28e   : > { %v806_v33 = vmax.f32 %v2199_v31, %v2201_v32 }
 0x290   : > { %807 = vmax.xlane.f32.xlu1 %v806_v33  ;;  %v2205_v34 = vpop.f32.mrb[34].mxu1 }
 0x291   : > { %v2207_v35 = vpop.f32.mrb[35].mxu1 }
 0x292   : > { %2745 = vst [vmem:[#allocation5_spill] sm:$0xff] %v2207_v35  ;;  %v809_v36 = vmax.f32 %v2205_v34, %v2207_v35 }
 0x294   : > { %810 = vmax.xlane.f32.xlu0 %v809_v36  ;;  %v2211_v37 = vpop.f32.mrb[36].mxu1 }
 0x295   : > { %2746 = vst [vmem:[#allocation6_spill] sm:$0xff] %v2211_v37  ;;  %v2213_v38 = vpop.f32.mrb[37].mxu1 }
 0x296   : > { %2747 = vst [vmem:[#allocation7_spill] sm:$0xff] %v2213_v38  ;;  %v812_v39 = vmax.f32 %v2211_v37, %v2213_v38 }
 0x298   : > { %813 = vmax.xlane.f32.xlu1 %v812_v39  ;;  %v2217_v40 = vpop.f32.mrb[38].mxu1 }
 0x299   : > { %2748 = vst [vmem:[#allocation8_spill] sm:$0xff] %v2217_v40  ;;  %v2219_v41 = vpop.f32.mrb[39].mxu1 }
 0x29a   : > { %2749 = vst [vmem:[#allocation9_spill] sm:$0xff] %v2219_v41  ;;  %v815_v42 = vmax.f32 %v2217_v40, %v2219_v41 }
 0x29c   : > { %816 = vmax.xlane.f32.xlu0 %v815_v42  ;;  %v2223_v43 = vpop.f32.mrb[40].mxu1 }
 0x29d   : > { %2750 = vst [vmem:[#allocation10_spill] sm:$0xff] %v2223_v43  ;;  %v2225_v44 = vpop.f32.mrb[41].mxu1 }
 0x29e   : > { %2751 = vst [vmem:[#allocation11_spill] sm:$0xff] %v2225_v44  ;;  %v818_v45 = vmax.f32 %v2223_v43, %v2225_v44 }
 0x2a0   : > { %819 = vmax.xlane.f32.xlu1 %v818_v45  ;;  %v2229_v46 = vpop.f32.mrb[42].mxu1 }
 0x2a1   : > { %2752 = vst [vmem:[#allocation12_spill] sm:$0xff] %v2229_v46  ;;  %v2231_v49 = vpop.f32.mrb[43].mxu1 }
 0x2a2   : > { %2753 = vst [vmem:[#allocation13_spill] sm:$0xff] %v2231_v49  ;;  %v821_v52 = vmax.f32 %v2229_v46, %v2231_v49 }
 0x2a4   : > { %822 = vmax.xlane.f32.xlu0 %v821_v52  ;;  %v2235_v55 = vpop.f32.mrb[44].mxu1 }
 0x2a5   : > { %2754 = vst [vmem:[#allocation14_spill] sm:$0xff] %v2235_v55  ;;  %v2237_v58 = vpop.f32.mrb[45].mxu1 }
 0x2a6   : > { %2755 = vst [vmem:[#allocation15_spill] sm:$0xff] %v2237_v58  ;;  %v824_v61 = vmax.f32 %v2235_v55, %v2237_v58  ;;  %v225_v55 = vld [vmem:[%s2710_s1 + $0x8] sm:$0xf] }
 0x2a7   : > { %1524 = vmatmul.mubr.msk.f32.gmra.mrb[2].mxu0 %vm242_vm1, %v225_v55 }
 0x2a8   : > { %825 = vmax.xlane.f32.xlu1 %v824_v61  ;;  %v2241_v0 = vpop.f32.mrb[46].mxu1 }
 0x2a9   : > { %2756 = vst [vmem:[#allocation16_spill] sm:$0xff] %v2241_v0  ;;  %v2243_v3 = vpop.f32.mrb[47].mxu1 }
 0x2aa   : > { %2757 = vst [vmem:[#allocation17_spill] sm:$0xff] %v2243_v3  ;;  %v827_v6 = vmax.f32 %v2241_v0, %v2243_v3 }
 0x2ac   : > { %828 = vmax.xlane.f32.xlu0 %v827_v6  ;;  %v2247_v9 = vpop.f32.mrb[48].mxu1 }
 0x2ad   : > { %v2249_v12 = vpop.f32.mrb[49].mxu1 }
 0x2b0   : > { %v2253_v18 = vpop.f32.mrb[50].mxu1 }
 0x2b1   : > { %v2255_v21 = vpop.f32.mrb[51].mxu1 }
 0x2b4   : > { %v2259_v27 = vpop.f32.mrb[52].mxu1 }
 0x2b5   : > { %v2261_v30 = vpop.f32.mrb[53].mxu1 }
 0x2b8   : > { %v2265_v36 = vpop.f32.mrb[54].mxu1 }
 0x2b9   : > { %v2267_v39 = vpop.f32.mrb[55].mxu1 }
 0x2bc   : > { %v2271_v45 = vpop.f32.mrb[56].mxu1 }
 0x2bd   : > { %v2273_v52 = vpop.f32.mrb[57].mxu1 }
 0x2c0   : > { %v2277_v6 = vpop.f32.mrb[58].mxu1 }
 0x2c1   : > { %v2279_v24 = vpop.f32.mrb[59].mxu1 }
 0x2c4   : > { %v2283_v15 = vpop.f32.mrb[60].mxu1 }
 0x2c5   : > { %v2285_v3 = vpop.f32.mrb[61].mxu1 }
 0x2c8   : > { %v2289_v0 = vpop.f32.mrb[62].mxu1 }
 0x2c9   : > { %v2291_v58 = vpop.f32.mrb[63].mxu1 }
 0x2dd   : > { %v760_v33 = vpop.xlane.xlu1 %759 }
 0x2de   : > { %v854_v49 = vsub.f32 %v2103_v47, %v760_v33  ;;  %v855_v46 = vsub.f32 %v2105_v48, %v760_v33 }
 0x2e0   : > { %v918_v44 = vmul.f32 1.442695, %v854_v49  ;;  %v920_v42 = vmul.f32 1.442695, %v855_v46 }
 0x2e1   : > { %v763_v43 = vpop.xlane.xlu0 %762 }
 0x2e2   : > { %1678 = vpow2.f32 %v918_v44  ;;  %v856_v41 = vsub.f32 %v2109_v50, %v763_v43  ;;  %v857_v40 = vsub.f32 %v2111_v51, %v763_v43 }
 0x2e3   : > { %1680 = vpow2.f32 %v920_v42 }
 0x2e4   : > { %v922_v61 = vmul.f32 1.442695, %v856_v41  ;;  %v924_v38 = vmul.f32 1.442695, %v857_v40 }
 0x2e5   : > { %v766_v37 = vpop.xlane.xlu1 %765 }
 0x2e6   : > { %1682 = vpow2.f32 %v922_v61  ;;  %v858_v55 = vsub.f32 %v2115_v53, %v766_v37  ;;  %v859_v35 = vsub.f32 %v2117_v54, %v766_v37 }
 0x2e7   : > { %1684 = vpow2.f32 %v924_v38 }
 0x2e8   : > { %v926_v47 = vmul.f32 1.442695, %v858_v55  ;;  %v928_v48 = vmul.f32 1.442695, %v859_v35 }
 0x2e9   : > { %v769_v49 = vpop.xlane.xlu1 %768 }
 0x2ea   : > { %1686 = vpow2.f32 %v926_v47  ;;  %v860_v44 = vsub.f32 %v2121_v56, %v769_v49  ;;  %v861_v50 = vsub.f32 %v2123_v57, %v769_v49 }
 0x2eb   : > { %1688 = vpow2.f32 %v928_v48  ;;  %v2758_v48 = vmax.f32 %v2247_v9, %v2249_v12 }
 0x2ec   : > { %v2307_v51 = vpop.eup %1678  ;;  %v930_v41 = vmul.f32 1.442695, %v860_v44  ;;  %v932_v40 = vmul.f32 1.442695, %v861_v50 }
 0x2ed   : > { %v2309_v43 = vpop.eup %1680  ;;  %v772_v46 = vpop.xlane.xlu1 %771 }
 0x2ee   : > { %1690 = vpow2.f32 %v930_v41  ;;  %v862_v53 = vsub.f32 %v2127_v59, %v772_v46  ;;  %v863_v54 = vsub.f32 %v2129_v60, %v772_v46  ;;  %v1046_v35 = vadd.f32 %v2309_v43, %v2307_v51 }
 0x2ef   : > { %1692 = vpow2.f32 %v932_v40 }
 0x2f0   : > { %v2315_v56 = vpop.eup %1682  ;;  %v934_v57 = vmul.f32 1.442695, %v862_v53  ;;  %v936_v37 = vmul.f32 1.442695, %v863_v54  ;;  %1047 = vadd.xlane.f32.xlu1 %v1046_v35  ;;  %v2759_v53 = vmax.f32 %v2253_v18, %v2255_v21 }
 0x2f1   : > { %v2317_v38 = vpop.eup %1684  ;;  %v775_v33 = vpop.xlane.xlu1 %774 }
 0x2f2   : > { %1694 = vpow2.f32 %v934_v57  ;;  %v864_v42 = vsub.f32 %v2133_v62, %v775_v33  ;;  %v865_v61 = vsub.f32 %v2135_v63, %v775_v33  ;;  %v1049_v59 = vadd.f32 %v2317_v38, %v2315_v56 }
 0x2f3   : > { %1696 = vpow2.f32 %v936_v37 }
 0x2f4   : > { %v2323_v60 = vpop.eup %1686  ;;  %v938_v55 = vmul.f32 1.442695, %v864_v42  ;;  %v940_v47 = vmul.f32 1.442695, %v865_v61  ;;  %831 = vmax.xlane.f32.xlu1 %v2758_v48  ;;  %1050 = vadd.xlane.f32.xlu0 %v1049_v59  ;;  %v2760_v61 = vmax.f32 %v2259_v27, %v2261_v30 }
 0x2f5   : > { %v2328_v49 = vpop.eup %1688  ;;  %v778_v44 = vpop.xlane.xlu1 %777 }
 0x2f6   : > { %1698 = vpow2.f32 %v938_v55  ;;  %v866_v62 = vsub.f32 %v2139_v1, %v778_v44  ;;  %v867_v63 = vsub.f32 %v2141_v2, %v778_v44  ;;  %v1052_v50 = vadd.f32 %v2328_v49, %v2323_v60 }
 0x2f7   : > { %1700 = vpow2.f32 %v940_v47 }
 0x2f8   : > { %v2334_v41 = vpop.eup %1690  ;;  %v942_v40 = vmul.f32 1.442695, %v866_v62  ;;  %v944_v46 = vmul.f32 1.442695, %v867_v63  ;;  %1053 = vadd.xlane.f32.xlu1 %v1052_v50  ;;  %834 = vmax.xlane.f32.xlu0 %v2759_v53  ;;  %v2761_v63 = vmax.f32 %v2265_v36, %v2267_v39 }
 0x2f9   : > { %v2339_v54 = vpop.eup %1692  ;;  %v781_v35 = vpop.xlane.xlu1 %780 }
 0x2fa   : > { %1702 = vpow2.f32 %v942_v40  ;;  %v868_v1 = vsub.f32 %v2145_v4, %v781_v35  ;;  %v869_v2 = vsub.f32 %v2147_v5, %v781_v35  ;;  %v1055_v57 = vadd.f32 %v2339_v54, %v2334_v41 }
 0x2fb   : > { %1704 = vpow2.f32 %v944_v46 }
 0x2fc   : > { %v2345_v37 = vpop.eup %1694  ;;  %v946_v33 = vmul.f32 1.442695, %v868_v1  ;;  %v948_v42 = vmul.f32 1.442695, %v869_v2  ;;  %837 = vmax.xlane.f32.xlu1 %v2760_v61  ;;  %1056 = vadd.xlane.f32.xlu0 %v1055_v57  ;;  %v2762_v2 = vmax.f32 %v2271_v45, %v2273_v52 }
 0x2fd   : > { %v2350_v59 = vpop.eup %1696  ;;  %v784_v55 = vpop.xlane.xlu1 %783 }
 0x2fe   : > { %1706 = vpow2.f32 %v946_v33  ;;  %v870_v4 = vsub.f32 %v2151_v7, %v784_v55  ;;  %v871_v5 = vsub.f32 %v2153_v8, %v784_v55  ;;  %v1058_v47 = vadd.f32 %v2350_v59, %v2345_v37 }
 0x2ff   : > { %1708 = vpow2.f32 %v948_v42 }
 0x300   : > { %v2356_v48 = vpop.eup %1698  ;;  %v950_v44 = vmul.f32 1.442695, %v870_v4  ;;  %v952_v62 = vmul.f32 1.442695, %v871_v5  ;;  %1059 = vadd.xlane.f32.xlu1 %v1058_v47  ;;  %840 = vmax.xlane.f32.xlu0 %v2761_v63  ;;  %v2763_v5 = vmax.f32 %v2277_v6, %v2279_v24 }
 0x301   : > { %v2361_v50 = vpop.eup %1700  ;;  %v787_v40 = vpop.xlane.xlu1 %786 }
 0x302   : > { %1710 = vpow2.f32 %v950_v44  ;;  %v872_v7 = vsub.f32 %v2157_v10, %v787_v40  ;;  %v873_v8 = vsub.f32 %v2159_v11, %v787_v40  ;;  %v1061_v46 = vadd.f32 %v2361_v50, %v2356_v48 }
 0x303   : > { %1712 = vpow2.f32 %v952_v62 }
 0x304   : > { %v2367_v53 = vpop.eup %1702  ;;  %v954_v35 = vmul.f32 1.442695, %v872_v7  ;;  %v956_v1 = vmul.f32 1.442695, %v873_v8  ;;  %843 = vmax.xlane.f32.xlu1 %v2762_v2  ;;  %1062 = vadd.xlane.f32.xlu0 %v1061_v46  ;;  %v2764_v8 = vmax.f32 %v2283_v15, %v2285_v3 }
 0x305   : > { %v2372_v57 = vpop.eup %1704  ;;  %v790_v33 = vpop.xlane.xlu1 %789 }
 0x306   : > { %1714 = vpow2.f32 %v954_v35  ;;  %v874_v10 = vsub.f32 %v2163_v13, %v790_v33  ;;  %v875_v11 = vsub.f32 %v2165_v14, %v790_v33  ;;  %v1064_v42 = vadd.f32 %v2372_v57, %v2367_v53 }
 0x307   : > { %1716 = vpow2.f32 %v956_v1 }
 0x308   : > { %v2378_v61 = vpop.eup %1706  ;;  %v958_v55 = vmul.f32 1.442695, %v874_v10  ;;  %v960_v4 = vmul.f32 1.442695, %v875_v11  ;;  %1065 = vadd.xlane.f32.xlu1 %v1064_v42  ;;  %846 = vmax.xlane.f32.xlu0 %v2763_v5  ;;  %v2765_v11 = vmax.f32 %v2289_v0, %v2291_v58 }
 0x309   : > { %v2383_v47 = vpop.eup %1708  ;;  %v793_v44 = vpop.xlane.xlu0 %792 }
 0x30a   : > { %1718 = vpow2.f32 %v958_v55  ;;  %v876_v13 = vsub.f32 %v2169_v16, %v793_v44  ;;  %v877_v14 = vsub.f32 %v2171_v17, %v793_v44  ;;  %v1067_v62 = vadd.f32 %v2383_v47, %v2378_v61 }
 0x30b   : > { %1720 = vpow2.f32 %v960_v4 }
 0x30c   : > { %v2389_v63 = vpop.eup %1710  ;;  %v962_v40 = vmul.f32 1.442695, %v876_v13  ;;  %v964_v7 = vmul.f32 1.442695, %v877_v14  ;;  %849 = vmax.xlane.f32.xlu1 %v2764_v8  ;;  %1068 = vadd.xlane.f32.xlu0 %v1067_v62 }
 0x30d   : > { %v2394_v46 = vpop.eup %1712  ;;  %v796_v35 = vpop.xlane.xlu1 %795 }
 0x30e   : > { %1722 = vpow2.f32 %v962_v40  ;;  %v878_v16 = vsub.f32 %v2175_v19, %v796_v35  ;;  %v879_v17 = vsub.f32 %v2177_v20, %v796_v35  ;;  %v1070_v1 = vadd.f32 %v2394_v46, %v2389_v63 }
 0x30f   : > { %1724 = vpow2.f32 %v964_v7 }
 0x310   : > { %v2400_v2 = vpop.eup %1714  ;;  %v966_v33 = vmul.f32 1.442695, %v878_v16  ;;  %v968_v10 = vmul.f32 1.442695, %v879_v17  ;;  %1071 = vadd.xlane.f32.xlu1 %v1070_v1  ;;  %852 = vmax.xlane.f32.xlu0 %v2765_v11 }
 0x311   : > { %v2405_v42 = vpop.eup %1716  ;;  %v799_v55 = vpop.xlane.xlu0 %798 }
 0x312   : > { %1726 = vpow2.f32 %v966_v33  ;;  %v880_v19 = vsub.f32 %v2181_v22, %v799_v55  ;;  %v881_v20 = vsub.f32 %v2183_v23, %v799_v55  ;;  %v1073_v4 = vadd.f32 %v2405_v42, %v2400_v2 }
 0x313   : > { %1728 = vpow2.f32 %v968_v10 }
 0x314   : > { %v2411_v5 = vpop.eup %1718  ;;  %v970_v44 = vmul.f32 1.442695, %v880_v19  ;;  %v972_v13 = vmul.f32 1.442695, %v881_v20  ;;  %1074 = vadd.xlane.f32.xlu0 %v1073_v4 }
 0x315   : > { %v2413_v14 = vpop.eup %1720  ;;  %v802_v62 = vpop.xlane.xlu1 %801 }
 0x316   : > { %1730 = vpow2.f32 %v970_v44  ;;  %v882_v40 = vsub.f32 %v2187_v25, %v802_v62  ;;  %v883_v7 = vsub.f32 %v2189_v26, %v802_v62  ;;  %v1076_v22 = vadd.f32 %v2413_v14, %v2411_v5 }
 0x317   : > { %1732 = vpow2.f32 %v972_v13 }
 0x318   : > { %v2419_v23 = vpop.eup %1722  ;;  %v974_v8 = vmul.f32 1.442695, %v882_v40  ;;  %v976_v35 = vmul.f32 1.442695, %v883_v7  ;;  %1077 = vadd.xlane.f32.xlu1 %v1076_v22  ;;  %v2766_v22 = vld [vmem:[#allocation5_spill] sm:$0xff] }
 0x319   : > { %v2421_v16 = vpop.eup %1724  ;;  %v805_v17 = vpop.xlane.xlu0 %804 }
 0x31a   : > { %1734 = vpow2.f32 %v974_v8  ;;  %v884_v1 = vsub.f32 %v2193_v28, %v805_v17  ;;  %v885_v33 = vsub.f32 %v2195_v29, %v805_v17  ;;  %v1079_v25 = vadd.f32 %v2421_v16, %v2419_v23 }
 0x31b   : > { %1736 = vpow2.f32 %v976_v35 }
 0x31c   : > { %v2427_v26 = vpop.eup %1726  ;;  %v978_v10 = vmul.f32 1.442695, %v884_v1  ;;  %v980_v11 = vmul.f32 1.442695, %v885_v33  ;;  %1080 = vadd.xlane.f32.xlu0 %v1079_v25  ;;  %v2768_v25 = vld [vmem:[#allocation6_spill] sm:$0xff] }
 0x31d   : > { %v2429_v55 = vpop.eup %1728  ;;  %v808_v19 = vpop.xlane.xlu1 %807 }
 0x31e   : > { %1738 = vpow2.f32 %v978_v10  ;;  %v886_v20 = vsub.f32 %v2199_v31, %v808_v19  ;;  %v887_v4 = vsub.f32 %v2201_v32, %v808_v19  ;;  %v1082_v28 = vadd.f32 %v2429_v55, %v2427_v26 }
 0x31f   : > { %1740 = vpow2.f32 %v980_v11  ;;  %v2769_v11 = vld [vmem:[#allocation7_spill] sm:$0xff] }
 0x320   : > { %v2435_v29 = vpop.eup %1730  ;;  %v982_v44 = vmul.f32 1.442695, %v886_v20  ;;  %v984_v13 = vmul.f32 1.442695, %v887_v4  ;;  %1083 = vadd.xlane.f32.xlu1 %v1082_v28 }
 0x321   : > { %v2437_v62 = vpop.eup %1732  ;;  %v811_v40 = vpop.xlane.xlu0 %810 }
 0x322   : > { %1742 = vpow2.f32 %v982_v44  ;;  %v888_v7 = vsub.f32 %v2205_v34, %v811_v40  ;;  %v889_v8 = vsub.f32 %v2766_v22, %v811_v40  ;;  %v1085_v31 = vadd.f32 %v2437_v62, %v2435_v29  ;;  %v2771_v40 = vld [vmem:[#allocation8_spill] sm:$0xff]  ;;  %v2772_v22 = vld [vmem:[#allocation9_spill] sm:$0xff] }
 0x323   : > { %1744 = vpow2.f32 %v984_v13 }
 0x324   : > { %v2443_v32 = vpop.eup %1734  ;;  %v986_v35 = vmul.f32 1.442695, %v888_v7  ;;  %v988_v17 = vmul.f32 1.442695, %v889_v8  ;;  %1086 = vadd.xlane.f32.xlu0 %v1085_v31 }
 0x325   : > { %2767 = vst [vmem:[#allocation5_spill] sm:$0xff] %v2443_v32  ;;  %v2445_v1 = vpop.eup %1736  ;;  %v814_v33 = vpop.xlane.xlu1 %813 }
 0x326   : > { %1746 = vpow2.f32 %v986_v35  ;;  %v890_v10 = vsub.f32 %v2768_v25, %v814_v33  ;;  %v891_v19 = vsub.f32 %v2769_v11, %v814_v33  ;;  %v1088_v34 = vadd.f32 %v2445_v1, %v2443_v32  ;;  %v2775_v11 = vld [vmem:[#allocation10_spill] sm:$0xff] }
 0x327   : > { %1748 = vpow2.f32 %v988_v17 }
 0x328   : > { %v2451_v20 = vpop.eup %1738  ;;  %v990_v4 = vmul.f32 1.442695, %v890_v10  ;;  %v992_v28 = vmul.f32 1.442695, %v891_v19  ;;  %1089 = vadd.xlane.f32.xlu1 %v1088_v34  ;;  %v2776_v34 = vld [vmem:[#allocation11_spill] sm:$0xff] }
 0x329   : > { %2770 = vst [vmem:[#allocation6_spill] sm:$0xff] %v2451_v20  ;;  %v2453_v44 = vpop.eup %1740  ;;  %v817_v13 = vpop.xlane.xlu0 %816 }
 0x32a   : > { %1750 = vpow2.f32 %v990_v4  ;;  %v892_v7 = vsub.f32 %v2771_v40, %v817_v13  ;;  %v893_v8 = vsub.f32 %v2772_v22, %v817_v13  ;;  %v1091_v31 = vadd.f32 %v2453_v44, %v2451_v20 }
 0x32b   : > { %1752 = vpow2.f32 %v992_v28 }
 0x32c   : > { %v2459_v35 = vpop.eup %1742  ;;  %v994_v17 = vmul.f32 1.442695, %v892_v7  ;;  %v996_v33 = vmul.f32 1.442695, %v893_v8  ;;  %1092 = vadd.xlane.f32.xlu0 %v1091_v31  ;;  %v2779_v31 = vld [vmem:[#allocation12_spill] sm:$0xff] }
 0x32d   : > { %2773 = vst [vmem:[#allocation7_spill] sm:$0xff] %v2459_v35  ;;  %v2461_v25 = vpop.eup %1744  ;;  %v820_v10 = vpop.xlane.xlu1 %819 }
 0x32e   : > { %2774 = vst [vmem:[#allocation8_spill] sm:$0xff] %v2461_v25  ;;  %1754 = vpow2.f32 %v994_v17  ;;  %v894_v19 = vsub.f32 %v2775_v11, %v820_v10  ;;  %v895_v4 = vsub.f32 %v2776_v34, %v820_v10  ;;  %v1094_v13 = vadd.f32 %v2461_v25, %v2459_v35  ;;  %v2780_v17 = vld [vmem:[#allocation13_spill] sm:$0xff] }
 0x32f   : > { %1756 = vpow2.f32 %v996_v33 }
 0x330   : > { %v2467_v40 = vpop.eup %1746  ;;  %v998_v28 = vmul.f32 1.442695, %v894_v19  ;;  %v1000_v22 = vmul.f32 1.442695, %v895_v4  ;;  %1095 = vadd.xlane.f32.xlu1 %v1094_v13  ;;  %v2782_v13 = vld [vmem:[#allocation14_spill] sm:$0xff] }
 0x331   : > { %2777 = vst [vmem:[#allocation9_spill] sm:$0xff] %v2467_v40  ;;  %v2469_v7 = vpop.eup %1748  ;;  %v823_v8 = vpop.xlane.xlu0 %822 }
 0x332   : > { %2778 = vst [vmem:[#allocation10_spill] sm:$0xff] %v2469_v7  ;;  %1758 = vpow2.f32 %v998_v28  ;;  %v896_v32 = vsub.f32 %v2779_v31, %v823_v8  ;;  %v897_v20 = vsub.f32 %v2780_v17, %v823_v8  ;;  %v1097_v10 = vadd.f32 %v2469_v7, %v2467_v40  ;;  %v2783_v28 = vld [vmem:[#allocation15_spill] sm:$0xff] }
 0x333   : > { %1760 = vpow2.f32 %v1000_v22 }
 0x334   : > { %v2475_v11 = vpop.eup %1750  ;;  %v1002_v33 = vmul.f32 1.442695, %v896_v32  ;;  %v1004_v34 = vmul.f32 1.442695, %v897_v20  ;;  %1098 = vadd.xlane.f32.xlu0 %v1097_v10  ;;  %v2784_v10 = vld [vmem:[#allocation16_spill] sm:$0xff] }
 0x335   : > { %2781 = vst [vmem:[#allocation11_spill] sm:$0xff] %v2475_v11  ;;  %v2477_v19 = vpop.eup %1752  ;;  %v826_v4 = vpop.xlane.xlu1 %825 }
 0x336   : > { %1762 = vpow2.f32 %v1002_v33  ;;  %v898_v35 = vsub.f32 %v2782_v13, %v826_v4  ;;  %v899_v25 = vsub.f32 %v2783_v28, %v826_v4  ;;  %v1100_v8 = vadd.f32 %v2477_v19, %v2475_v11  ;;  %v2785_v33 = vld [vmem:[#allocation17_spill] sm:$0xff] }
 0x337   : > { %1764 = vpow2.f32 %v1004_v34 }
 0x338   : > { %v2483_v31 = vpop.eup %1754  ;;  %v1006_v22 = vmul.f32 1.442695, %v898_v35  ;;  %v1008_v17 = vmul.f32 1.442695, %v899_v25  ;;  %1101 = vadd.xlane.f32.xlu1 %v1100_v8 }
 0x339   : > { %v2485_v32 = vpop.eup %1756  ;;  %v829_v20 = vpop.xlane.xlu0 %828 }
 0x33a   : > { %1766 = vpow2.f32 %v1006_v22  ;;  %v900_v40 = vsub.f32 %v2784_v10, %v829_v20  ;;  %v901_v7 = vsub.f32 %v2785_v33, %v829_v20  ;;  %v1103_v4 = vadd.f32 %v2485_v32, %v2483_v31 }
 0x33b   : > { %1768 = vpow2.f32 %v1008_v17 }
 0x33c   : > { %v2491_v13 = vpop.eup %1758  ;;  %v1010_v34 = vmul.f32 1.442695, %v900_v40  ;;  %v1012_v28 = vmul.f32 1.442695, %v901_v7  ;;  %1104 = vadd.xlane.f32.xlu0 %v1103_v4 }
 0x33d   : > { %2786 = vst [vmem:[#allocation12_spill] sm:$0xff] %v2491_v13  ;;  %v2493_v35 = vpop.eup %1760 }
 0x33e   : > { %2787 = vst [vmem:[#allocation13_spill] sm:$0xff] %v2493_v35  ;;  %1770 = vpow2.f32 %v1010_v34  ;;  %v1106_v25 = vadd.f32 %v2493_v35, %v2491_v13 }
 0x33f   : > { %1772 = vpow2.f32 %v1012_v28 }
 0x340   : > { %v2497_v8 = vpop.eup %1762  ;;  %1107 = vadd.xlane.f32.xlu1 %v1106_v25 }
 0x341   : > { %2788 = vst [vmem:[#allocation14_spill] sm:$0xff] %v2497_v8  ;;  %v2499_v22 = vpop.eup %1764 }
 0x342   : > { %2789 = vst [vmem:[#allocation15_spill] sm:$0xff] %v2499_v22  ;;  %v1109_v17 = vadd.f32 %v2499_v22, %v2497_v8 }
 0x344   : > { %v2503_v20 = vpop.eup %1766  ;;  %1110 = vadd.xlane.f32.xlu0 %v1109_v17 }
 0x345   : > { %2790 = vst [vmem:[#allocation16_spill] sm:$0xff] %v2503_v20  ;;  %v2505_v40 = vpop.eup %1768 }
 0x346   : > { %2791 = vst [vmem:[#allocation17_spill] sm:$0xff] %v2505_v40  ;;  %v1112_v7 = vadd.f32 %v2505_v40, %v2503_v20 }
 0x348   : > { %v2509_v10 = vpop.eup %1770  ;;  %1113 = vadd.xlane.f32.xlu1 %v1112_v7 }
 0x349   : > { %2792 = vst [vmem:[#allocation18_spill] sm:$0xff] %v2509_v10  ;;  %v2511_v33 = vpop.eup %1772 }
 0x34a   : > { %2793 = vst [vmem:[#allocation19_spill] sm:$0xff] %v2511_v33  ;;  %v1115_v4 = vadd.f32 %v2511_v33, %v2509_v10 }
 0x34c   : > { %1116 = vadd.xlane.f32.xlu0 %v1115_v4 }
 0x37d   : > { %v1048_v34 = vpop.xlane.xlu1 %1047 }
 0x37e   : > { %1774 = vrcp.f32 %v1048_v34 }
 0x381   : > { %v832_v28 = vpop.xlane.xlu1 %831  ;;  %v1051_v25 = vpop.xlane.xlu0 %1050 }
 0x382   : > { %v902_v17 = vsub.f32 %v2247_v9, %v832_v28  ;;  %v903_v13 = vsub.f32 %v2249_v12, %v832_v28  ;;  %1776 = vrcp.f32 %v1051_v25 }
 0x384   : > { %v1014_v8 = vmul.f32 1.442695, %v902_v17  ;;  %v1016_v20 = vmul.f32 1.442695, %v903_v13 }
 0x385   : > { %v1054_v40 = vpop.xlane.xlu1 %1053  ;;  %v835_v22 = vpop.xlane.xlu0 %834 }
 0x386   : > { %1778 = vpow2.f32 %v1014_v8  ;;  %v904_v7 = vsub.f32 %v2253_v18, %v835_v22  ;;  %v905_v35 = vsub.f32 %v2255_v21, %v835_v22 }
 0x387   : > { %1780 = vpow2.f32 %v1016_v20 }
 0x388   : > { %1782 = vrcp.f32 %v1054_v40  ;;  %v1018_v4 = vmul.f32 1.442695, %v904_v7  ;;  %v1020_v34 = vmul.f32 1.442695, %v905_v35  ;;  %v1775_v11 = vpop.eup %1774 }
 0x389   : > { %v838_v10 = vpop.xlane.xlu1 %837  ;;  %v1057_v33 = vpop.xlane.xlu0 %1056  ;;  %v1207_v21 = vmul.f32 %v1775_v11, %v2309_v43  ;;  %v1206_v35 = vmul.f32 %v1775_v11, %v2307_v51 }
 0x38a   : > { %1784 = vpow2.f32 %v1018_v4  ;;  %v906_v9 = vsub.f32 %v2259_v27, %v838_v10  ;;  %v907_v12 = vsub.f32 %v2261_v30, %v838_v10 }
 0x38b   : > { %1786 = vpow2.f32 %v1020_v34 }
 0x38c   : > { %v1777_v13 = vpop.eup %1776  ;;  %v1022_v28 = vmul.f32 1.442695, %v906_v9  ;;  %v1024_v8 = vmul.f32 1.442695, %v907_v12  ;;  %1788 = vrcp.f32 %v1057_v33 }
 0x38d   : > { %v1060_v18 = vpop.xlane.xlu1 %1059  ;;  %v841_v25 = vpop.xlane.xlu0 %840  ;;  %v1209_v22 = vmul.f32 %v1777_v13, %v2317_v38  ;;  %v1208_v20 = vmul.f32 %v1777_v13, %v2315_v56 }
 0x38e   : > { %1790 = vpow2.f32 %v1022_v28  ;;  %v908_v27 = vsub.f32 %v2265_v36, %v841_v25  ;;  %v909_v30 = vsub.f32 %v2267_v39, %v841_v25 }
 0x38f   : > { %1792 = vpow2.f32 %v1024_v8  ;;  %v1569_v40 = vpack.c.bf16 %v1209_v22, %v1207_v21  ;;  %v1571_v10 = vpack.c.bf16 %v1208_v20, %v1206_v35 }
 0x390   : > { %v2527_v17 = vpop.eup %1778  ;;  %1794 = vrcp.f32 %v1060_v18  ;;  %v1026_v33 = vmul.f32 1.442695, %v908_v27  ;;  %v1028_v7 = vmul.f32 1.442695, %v909_v30 }
 0x391   : > { %v2529_v43 = vpop.eup %1780  ;;  %v844_v38 = vpop.xlane.xlu1 %843  ;;  %1570 = vmatprep.subr.bf16.mxu0 %v1569_v40 }
 0x392   : > { %v1063_v51 = vpop.xlane.xlu0 %1062  ;;  %v1783_v11 = vpop.eup %1782  ;;  %1796 = vpow2.f32 %v1026_v33  ;;  %v910_v56 = vsub.f32 %v2271_v45, %v844_v38  ;;  %v911_v36 = vsub.f32 %v2273_v52, %v844_v38  ;;  %1572 = vmatpush1.bf16.xpose.msra.mxu0 %v1571_v10  ;;  %v1118_v39 = vadd.f32 %v2529_v43, %v2527_v17 }
 0x393   : > { %1798 = vpow2.f32 %v1028_v7  ;;  %v1211_v8 = vmul.f32 %v1783_v11, %v2328_v49  ;;  %v1210_v22 = vmul.f32 %v1783_v11, %v2323_v60 }
 0x394   : > { %v2535_v4 = vpop.eup %1784  ;;  %v1030_v34 = vmul.f32 1.442695, %v910_v56  ;;  %v1032_v9 = vmul.f32 1.442695, %v911_v36  ;;  %1800 = vrcp.f32 %v1063_v51  ;;  %1119 = vadd.xlane.f32.xlu1 %v1118_v39 }
 0x395   : > { %v2537_v12 = vpop.eup %1786  ;;  %v1066_v13 = vpop.xlane.xlu1 %1065 }
 0x396   : > { %v847_v28 = vpop.xlane.xlu0 %846  ;;  %v1789_v45 = vpop.eup %1788  ;;  %1802 = vpow2.f32 %v1030_v34  ;;  %v1121_v25 = vadd.f32 %v2537_v12, %v2535_v4 }
 0x397   : > { %v912_v52 = vsub.f32 %v2277_v6, %v847_v28  ;;  %v913_v18 = vsub.f32 %v2279_v24, %v847_v28  ;;  %1804 = vpow2.f32 %v1032_v9  ;;  %v1213_v21 = vmul.f32 %v1789_v45, %v2339_v54 }
 0x398   : > { %v1212_v35 = vmul.f32 %v1789_v45, %v2334_v41  ;;  %v2547_v20 = vpop.eup %1790  ;;  %1122 = vadd.xlane.f32.xlu0 %v1121_v25  ;;  %1806 = vrcp.f32 %v1066_v13 }
 0x399   : > { %v1034_v27 = vmul.f32 1.442695, %v912_v52  ;;  %v1036_v49 = vmul.f32 1.442695, %v913_v18  ;;  %v2549_v30 = vpop.eup %1792  ;;  %v850_v6 = vpop.xlane.xlu1 %849  ;;  %v1573_v24 = vpack.c.bf16 %v1213_v21, %v1211_v8 }
 0x39a   : > { %v1069_v40 = vpop.xlane.xlu0 %1068  ;;  %v1575_v10 = vpack.c.bf16 %v1212_v35, %v1210_v22  ;;  %v1795_v33 = vpop.eup %1794  ;;  %v914_v54 = vsub.f32 %v2283_v15, %v850_v6  ;;  %v915_v60 = vsub.f32 %v2285_v3, %v850_v6  ;;  %v1124_v41 = vadd.f32 %v2549_v30, %v2547_v20 }
 0x39b   : > { %1808 = vpow2.f32 %v1034_v27  ;;  %1574 = vmatprep.subr.bf16.mxu0 %v1573_v24  ;;  %v1215_v36 = vmul.f32 %v1795_v33, %v2350_v59  ;;  %v1214_v28 = vmul.f32 %v1795_v33, %v2345_v37 }
 0x39c   : > { %1810 = vpow2.f32 %v1036_v49  ;;  %v2555_v7 = vpop.eup %1796  ;;  %v1038_v38 = vmul.f32 1.442695, %v914_v54  ;;  %v1040_v51 = vmul.f32 1.442695, %v915_v60  ;;  %1576 = vmatpush1.bf16.xpose.msra.mxu0 %v1575_v10  ;;  %1125 = vadd.xlane.f32.xlu1 %v1124_v41 }
 0x39d   : > { %1812 = vrcp.f32 %v1069_v40  ;;  %v2557_v11 = vpop.eup %1798  ;;  %v1072_v3 = vpop.xlane.xlu1 %1071 }
 0x39e   : > { %v853_v56 = vpop.xlane.xlu0 %852  ;;  %v1801_v15 = vpop.eup %1800  ;;  %1814 = vpow2.f32 %v1038_v38  ;;  %v1127_v9 = vadd.f32 %v2557_v11, %v2555_v7 }
 0x39f   : > { %v916_v39 = vsub.f32 %v2289_v0, %v853_v56  ;;  %v917_v34 = vsub.f32 %v2291_v58, %v853_v56  ;;  %1816 = vpow2.f32 %v1040_v51  ;;  %v1217_v13 = vmul.f32 %v1801_v15, %v2361_v50 }
 0x3a0   : > { %v1216_v8 = vmul.f32 %v1801_v15, %v2356_v48  ;;  %v2567_v45 = vpop.eup %1802  ;;  %1128 = vadd.xlane.f32.xlu0 %v1127_v9  ;;  %1818 = vrcp.f32 %v1072_v3 }
 0x3a1   : > { %v1042_v59 = vmul.f32 1.442695, %v916_v39  ;;  %v1044_v52 = vmul.f32 1.442695, %v917_v34  ;;  %v2569_v18 = vpop.eup %1804  ;;  %v1577_v0 = vpack.c.bf16 %v1217_v13, %v1215_v36 }
 0x3a2   : > { %v1075_v58 = vpop.xlane.xlu0 %1074  ;;  %v1579_v25 = vpack.c.bf16 %v1216_v8, %v1214_v28  ;;  %v1130_v21 = vadd.f32 %v2569_v18, %v2567_v45  ;;  %v1807_v50 = vpop.eup %1806 }
 0x3a3   : > { %1820 = vpow2.f32 %v1042_v59  ;;  %1578 = vmatprep.subr.bf16.mxu0 %v1577_v0  ;;  %v1219_v49 = vmul.f32 %v1807_v50, %v2372_v57  ;;  %v1218_v24 = vmul.f32 %v1807_v50, %v2367_v53 }
 0x3a4   : > { %1822 = vpow2.f32 %v1044_v52  ;;  %1580 = vmatpush1.bf16.xpose.msra.mxu0 %v1579_v25  ;;  %1131 = vadd.xlane.f32.xlu1 %v1130_v21  ;;  %v227_v21 = vld [vmem:[%s2711_s2 + $0x8] sm:$0xf] }
 0x3a5   : > { %v2573_v37 = vpop.eup %1808  ;;  %1824 = vrcp.f32 %v1075_v58  ;;  %v1078_v22 = vpop.xlane.xlu1 %1077 }
 0x3a6   : > { %v2575_v48 = vpop.eup %1810  ;;  %1826 = vrcp.f32 %v1078_v22 }
 0x3a7   : > { %v1813_v35 = vpop.eup %1812  ;;  %v1133_v27 = vadd.f32 %v2575_v48, %v2573_v37 }
 0x3a8   : > { %v1221_v6 = vmul.f32 %v1813_v35, %v2383_v47  ;;  %v1220_v40 = vmul.f32 %v1813_v35, %v2378_v61  ;;  %v2583_v10 = vpop.eup %1814 }
 0x3a9   : > { %1134 = vadd.xlane.f32.xlu0 %v1133_v27  ;;  %v2585_v33 = vpop.eup %1816  ;;  %v1081_v60 = vpop.xlane.xlu0 %1080 }
 0x3aa   : > { %v1581_v54 = vpack.c.bf16 %v1221_v6, %v1219_v49  ;;  %v1583_v41 = vpack.c.bf16 %v1220_v40, %v1218_v24  ;;  %1828 = vrcp.f32 %v1081_v60  ;;  %v1136_v38 = vadd.f32 %v2585_v33, %v2583_v10  ;;  %v1819_v57 = vpop.eup %1818  ;;  %v229_v24 = vld [vmem:[%s2713_s4] sm:$0xf]  ;;  %v2795_v60 = vld [vmem:[#allocation5_spill] sm:$0xff] }
 0x3ab   : > { %v1223_v36 = vmul.f32 %v1819_v57, %v2394_v46  ;;  %v1222_v3 = vmul.f32 %v1819_v57, %v2389_v63 }
 0x3ac   : > { %1582 = vmatprep.subr.bf16.mxu0 %v1581_v54  ;;  %1137 = vadd.xlane.f32.xlu1 %v1136_v38  ;;  %v2794_v54 = vld [vmem:[#allocation6_spill] sm:$0xff] }
 0x3ad   : > { %v2589_v47 = vpop.eup %1820  ;;  %1584 = vmatpush1.bf16.xpose.msra.mxu0 %v1583_v41  ;;  %v1084_v61 = vpop.xlane.xlu1 %1083 }
 0x3ae   : > { %v2591_v53 = vpop.eup %1822  ;;  %1830 = vrcp.f32 %v1084_v61 }
 0x3af   : > { %v1825_v51 = vpop.eup %1824  ;;  %v1139_v56 = vadd.f32 %v2591_v53, %v2589_v47 }
 0x3b0   : > { %v1225_v15 = vmul.f32 %v1825_v51, %v2405_v42  ;;  %v1224_v39 = vmul.f32 %v1825_v51, %v2400_v2  ;;  %v1827_v28 = vpop.eup %1826 }
 0x3b1   : > { %1140 = vadd.xlane.f32.xlu0 %v1139_v56  ;;  %v1087_v9 = vpop.xlane.xlu0 %1086  ;;  %v1227_v52 = vmul.f32 %v1827_v28, %v2413_v14  ;;  %v1226_v63 = vmul.f32 %v1827_v28, %v2411_v5  ;;  %v2621_v28 = vpop.f32.mrb[2].mxu0 }
 0x3b2   : > { %v1585_v34 = vpack.c.bf16 %v1225_v15, %v1223_v36  ;;  %v1587_v13 = vpack.c.bf16 %v1224_v39, %v1222_v3  ;;  %1832 = vrcp.f32 %v1087_v9  ;;  %v2796_v15 = vld [vmem:[#allocation8_spill] sm:$0xff]  ;;  %v2799_v9 = vld [vmem:[#allocation7_spill] sm:$0xff] }
 0x3b4   : > { %1586 = vmatprep.subr.bf16.mxu0 %v1585_v34  ;;  %v1829_v8 = vpop.eup %1828 }
 0x3b5   : > { %1588 = vmatpush1.bf16.xpose.msra.mxu0 %v1587_v13  ;;  %v1090_v59 = vpop.xlane.xlu1 %1089  ;;  %v1229_v46 = vmul.f32 %v1829_v8, %v2421_v16  ;;  %v1228_v42 = vmul.f32 %v1829_v8, %v2419_v23 }
 0x3b6   : > { %1834 = vrcp.f32 %v1090_v59  ;;  %v2623_v59 = vpop.f32.mrb[3].mxu0 }
 0x3b7   : > { %v1589_v2 = vpack.c.bf16 %v1229_v46, %v1227_v52  ;;  %v1591_v0 = vpack.c.bf16 %v1228_v42, %v1226_v63 }
 0x3b8   : > { %v1831_v25 = vpop.eup %1830 }
 0x3b9   : > { %1590 = vmatprep.subr.bf16.mxu0 %v1589_v2  ;;  %v1093_v58 = vpop.xlane.xlu0 %1092  ;;  %v1231_v16 = vmul.f32 %v1831_v25, %v2429_v55  ;;  %v1230_v22 = vmul.f32 %v1831_v25, %v2427_v26 }
 0x3ba   : > { %1836 = vrcp.f32 %v1093_v58 }
 0x3bc   : > { %v1833_v50 = vpop.eup %1832 }
 0x3bd   : > { %1592 = vmatpush1.bf16.xpose.msra.mxu0 %v1591_v0  ;;  %v1096_v14 = vpop.xlane.xlu1 %1095  ;;  %v1233_v23 = vmul.f32 %v1833_v50, %v2437_v62  ;;  %v1232_v5 = vmul.f32 %v1833_v50, %v2435_v29  ;;  %237 = vperm.xlu1 %1676, %v227_v21   ;;  %v2800_v21 = vld [vmem:[#allocation11_spill] sm:$0xff] }
 0x3be   : > { %1838 = vrcp.f32 %v1096_v14 }
 0x3bf   : > { %v1593_v35 = vpack.c.bf16 %v1233_v23, %v1231_v16  ;;  %v1595_v27 = vpack.c.bf16 %v1232_v5, %v1230_v22 }
 0x3c0   : > { %v1835_v6 = vpop.eup %1834 }
 0x3c1   : > { %1594 = vmatprep.subr.bf16.mxu0 %v1593_v35  ;;  %v1099_v49 = vpop.xlane.xlu0 %1098  ;;  %v1235_v62 = vmul.f32 %v1835_v6, %v2445_v1  ;;  %v1234_v41 = vmul.f32 %v1835_v6, %v2795_v60  ;;  %v2797_v1 = vld [vmem:[#allocation10_spill] sm:$0xff]  ;;  %v2801_v35 = vld [vmem:[#allocation13_spill] sm:$0xff]  ;;  %v2806_v60 = vld [vmem:[#allocation19_spill] sm:$0xff] }
 0x3c2   : > { %1840 = vrcp.f32 %v1099_v49  ;;  %v2802_v49 = vld [vmem:[#allocation15_spill] sm:$0xff] }
 0x3c4   : > { %v1837_v40 = vpop.eup %1836 }
 0x3c5   : > { %1596 = vmatpush1.bf16.xpose.msra.mxu0 %v1595_v27  ;;  %v1102_v55 = vpop.xlane.xlu1 %1101  ;;  %v1237_v29 = vmul.f32 %v1837_v40, %v2453_v44  ;;  %v1236_v26 = vmul.f32 %v1837_v40, %v2794_v54  ;;  %v2798_v44 = vld [vmem:[#allocation9_spill] sm:$0xff] }
 0x3c6   : > { %1842 = vrcp.f32 %v1102_v55  ;;  %v2805_v54 = vld [vmem:[#allocation17_spill] sm:$0xff] }
 0x3c7   : > { %1428 = vperm.xlu0 %1675, %v229_v24   ;;  %v1597_v38 = vpack.c.bf16 %v1237_v29, %v1235_v62  ;;  %v1599_v57 = vpack.c.bf16 %v1236_v26, %v1234_v41 }
 0x3c8   : > { %v1839_v51 = vpop.eup %1838 }
 0x3c9   : > { %1598 = vmatprep.subr.bf16.mxu0 %v1597_v38  ;;  %v1105_v61 = vpop.xlane.xlu0 %1104  ;;  %v1239_v3 = vmul.f32 %v1839_v51, %v2796_v15  ;;  %v1238_v13 = vmul.f32 %v1839_v51, %v2799_v9  ;;  %v2807_v38 = vld [vmem:[#allocation18_spill] sm:$0xff] }
 0x3ca   : > { %1844 = vrcp.f32 %v1105_v61  ;;  %v2808_v61 = vld [vmem:[#allocation16_spill] sm:$0xff] }
 0x3cc   : > { %v1841_v56 = vpop.eup %1840 }
 0x3cd   : > { %1600 = vmatpush1.bf16.xpose.msra.mxu0 %v1599_v57  ;;  %v1108_v36 = vpop.xlane.xlu1 %1107  ;;  %v1241_v39 = vmul.f32 %v1841_v56, %v2797_v1  ;;  %v1240_v34 = vmul.f32 %v1841_v56, %v2798_v44 }
 0x3ce   : > { %1846 = vrcp.f32 %v1108_v36 }
 0x3cf   : > { %v1601_v8 = vpack.c.bf16 %v1241_v39, %v1239_v3  ;;  %v1603_v52 = vpack.c.bf16 %v1240_v34, %v1238_v13 }
 0x3d0   : > { %v1843_v42 = vpop.eup %1842 }
 0x3d1   : > { %1602 = vmatprep.subr.bf16.mxu0 %v1601_v8  ;;  %v1111_v46 = vpop.xlane.xlu0 %1110  ;;  %v1243_v0 = vmul.f32 %v1843_v42, %v2477_v19  ;;  %v1242_v50 = vmul.f32 %v1843_v42, %v2800_v21  ;;  %v2803_v19 = vld [vmem:[#allocation14_spill] sm:$0xff] }
 0x3d2   : > { %1848 = vrcp.f32 %v1111_v46 }
 0x3d4   : > { %v1845_v63 = vpop.eup %1844 }
 0x3d5   : > { %1604 = vmatpush1.bf16.xpose.msra.mxu0 %v1603_v52  ;;  %v1114_v2 = vpop.xlane.xlu1 %1113  ;;  %v1245_v58 = vmul.f32 %v1845_v63, %v2485_v32  ;;  %v1244_v25 = vmul.f32 %v1845_v63, %v2483_v31  ;;  %v2804_v32 = vld [vmem:[#allocation12_spill] sm:$0xff] }
 0x3d6   : > { %1850 = vrcp.f32 %v1114_v2 }
 0x3d7   : > { %v1605_v14 = vpack.c.bf16 %v1245_v58, %v1243_v0  ;;  %v1607_v16 = vpack.c.bf16 %v1244_v25, %v1242_v50 }
 0x3d8   : > { %v1847_v5 = vpop.eup %1846 }
 0x3d9   : > { %1606 = vmatprep.subr.bf16.mxu0 %v1605_v14  ;;  %v1117_v23 = vpop.xlane.xlu0 %1116  ;;  %v1247_v27 = vmul.f32 %v1847_v5, %v2801_v35  ;;  %v1246_v40 = vmul.f32 %v1847_v5, %v2804_v32 }
 0x3da   : > { %1852 = vrcp.f32 %v1117_v23 }
 0x3dc   : > { %v1849_v22 = vpop.eup %1848 }
 0x3dd   : > { %1608 = vmatpush1.bf16.xpose.msra.mxu0 %v1607_v16  ;;  %v1249_v6 = vmul.f32 %v1849_v22, %v2802_v49  ;;  %v1248_v24 = vmul.f32 %v1849_v22, %v2803_v19 }
 0x3df   : > { %v1609_v31 = vpack.c.bf16 %v1249_v6, %v1247_v27  ;;  %v1611_v55 = vpack.c.bf16 %v1248_v24, %v1246_v40 }
 0x3e0   : > { %v1851_v62 = vpop.eup %1850 }
 0x3e1   : > { %1610 = vmatprep.subr.bf16.mxu0 %v1609_v31  ;;  %v1251_v26 = vmul.f32 %v1851_v62, %v2805_v54  ;;  %v1250_v51 = vmul.f32 %v1851_v62, %v2808_v61 }
 0x3e4   : > { %v1853_v29 = vpop.eup %1852 }
 0x3e5   : > { %1612 = vmatpush1.bf16.xpose.msra.mxu0 %v1611_v55  ;;  %v1253_v41 = vmul.f32 %v1853_v29, %v2806_v60  ;;  %v1252_v57 = vmul.f32 %v1853_v29, %v2807_v38 }
 0x3e7   : > { %v1613_v56 = vpack.c.bf16 %v1253_v41, %v1251_v26  ;;  %v1615_v36 = vpack.c.bf16 %v1252_v57, %v1250_v51  ;;  %v1870_v41 = vld [vmem:[%s2027_s11] sm:$0xff]  ;;  %s1875_s11 = sshll.u32 %s1938_s22, 4  ;;  %s1876_s11 = int_to_ptr.vmem [resolvable:$false] %s1875_s11 }
 0x3e8   : > { %s1877_s17 = scalar_lea.vmem %s1876_s11, 256  ;;  %p1878_p0 = scmp.lt.s32.totalorder %s2669_s10, %s1876_s11 }
 0x3e9   : > { %1614 = vmatprep.subr.bf16.mxu0 %v1613_v56  ;;  %p1879_p1 = scmp.lt.s32.totalorder %s1877_s17, %s1871_s16 }
 0x3eb   : > { %p1880_p2 = por %p1879_p1, %p1878_p0 }
 0x3ed   : > { %1616 = vmatpush1.bf16.xpose.msra.mxu0 %v1615_v36  ;;  %p1881_p3 = pnand %p1880_p2, %p1874_p13 }
 0x421   : > { %v1120_v15 = vpop.xlane.xlu1 %1119 }
 0x422   : > { %1854 = vrcp.f32 %v1120_v15 }
 0x425   : > { %v1123_v3 = vpop.xlane.xlu0 %1122 }
 0x426   : > { %1856 = vrcp.f32 %v1123_v3 }
 0x429   : > { %v1126_v1 = vpop.xlane.xlu1 %1125 }
 0x42a   : > { %1858 = vrcp.f32 %v1126_v1 }
 0x42c   : > { %v1855_v44 = vpop.eup %1854 }
 0x42d   : > { %v1129_v39 = vpop.xlane.xlu0 %1128  ;;  %v1255_v13 = vmul.f32 %v1855_v44, %v2529_v43  ;;  %v1254_v52 = vmul.f32 %v1855_v44, %v2527_v17 }
 0x42e   : > { %1860 = vrcp.f32 %v1129_v39 }
 0x430   : > { %v1857_v34 = vpop.eup %1856 }
 0x431   : > { %v1132_v9 = vpop.xlane.xlu1 %1131  ;;  %v1257_v8 = vmul.f32 %v1857_v34, %v2537_v12  ;;  %v1256_v46 = vmul.f32 %v1857_v34, %v2535_v4 }
 0x432   : > { %1862 = vrcp.f32 %v1132_v9 }
 0x433   : > { %v1617_v42 = vpack.c.bf16 %v1257_v8, %v1255_v13  ;;  %v1619_v63 = vpack.c.bf16 %v1256_v46, %v1254_v52 }
 0x434   : > { %v1859_v0 = vpop.eup %1858 }
 0x435   : > { %1618 = vmatprep.subr.bf16.mxu0 %v1617_v42  ;;  %v1259_v21 = vmul.f32 %v1859_v0, %v2549_v30  ;;  %v1258_v12 = vmul.f32 %v1859_v0, %v2547_v20 }
 0x436   : > { %v1135_v2 = vpop.xlane.xlu0 %1134  ;;  %1620 = vmatpush1.bf16.xpose.msra.mxu0 %v1619_v63 }
 0x437   : > { %1864 = vrcp.f32 %v1135_v2 }
 0x438   : > { %v1861_v58 = vpop.eup %1860 }
 0x439   : > { %v1138_v25 = vpop.xlane.xlu1 %1137  ;;  %v1261_v43 = vmul.f32 %v1861_v58, %v2557_v11  ;;  %v1260_v17 = vmul.f32 %v1861_v58, %v2555_v7 }
 0x43a   : > { %1866 = vrcp.f32 %v1138_v25 }
 0x43b   : > { %v1621_v50 = vpack.c.bf16 %v1261_v43, %v1259_v21  ;;  %v1623_v4 = vpack.c.bf16 %v1260_v17, %v1258_v12 }
 0x43c   : > { %v1863_v23 = vpop.eup %1862 }
 0x43d   : > { %1622 = vmatprep.subr.bf16.mxu0 %v1621_v50  ;;  %v238_v16 = vpop.permute.xlu1 %237  ;;  %v1263_v30 = vmul.f32 %v1863_v23, %v2569_v18  ;;  %v1262_v20 = vmul.f32 %v1863_v23, %v2567_v45 }
 0x43e   : > { %v1141_v14 = vpop.xlane.xlu0 %1140  ;;  %1624 = vmatpush1.bf16.xpose.msra.mxu0 %v1623_v4  ;;  %v329_v5 = vadd.f32 %v2623_v59, %v238_v16  ;;  %v327_v45 = vadd.f32 %v2621_v28, %v238_v16 }
 0x43f   : > { %1868 = vrcp.f32 %v1141_v14 }
 0x440   : > { %1334 = vmatprep.mubr.f32.mxu0 %v329_v5 }
 0x441   : > { %v1865_v22 = vpop.eup %1864 }
 0x442   : > { %v1265_v11 = vmul.f32 %v1865_v22, %v2575_v48  ;;  %v1264_v7 = vmul.f32 %v1865_v22, %v2573_v37 }
 0x444   : > { %v1625_v35 = vpack.c.bf16 %v1265_v11, %v1263_v30  ;;  %v1627_v27 = vpack.c.bf16 %v1264_v7, %v1262_v20  ;;  %v1867_v49 = vpop.eup %1866 }
 0x445   : > { %v1267_v19 = vmul.f32 %v1867_v49, %v2585_v33  ;;  %v1266_v24 = vmul.f32 %v1867_v49, %v2583_v10  ;;  %v228_v33 = vld [vmem:[%s2712_s3] sm:$0xf]  ;;  %v1937_v10 = vmov 839922192  }
 0x446   : > { %1626 = vmatprep.subr.bf16.mxu0 %v1625_v35  ;;  %v1429_v29 = vpop.permute.xlu0 %1428 }
 0x447   : > { %1628 = vmatpush1.bf16.xpose.msra.mxu0 %v1627_v27 }
 0x449   : > { %v1869_v6 = vpop.eup %1868 }
 0x44a   : > { %v1269_v59 = vmul.f32 %v1869_v6, %v2591_v53  ;;  %v1268_v18 = vmul.f32 %v1869_v6, %v2589_v47  ;;  %v1431_v47 = vunpack.c.l.s4 %v1937_v10  ;;  %v1433_v53 = vlaneseq }
 0x44c   : > { %v1629_v48 = vpack.c.bf16 %v1269_v59, %v1267_v19  ;;  %v1631_v32 = vpack.c.bf16 %v1268_v18, %v1266_v24  ;;  %v1432_v28 = vunpack.c.0.s8 %v1431_v47  ;;  %v1434_v31 = vshrl.u32 %v1433_v53, 7 }
 0x44e   : > { %1630 = vmatprep.subr.bf16.mxu0 %v1629_v48  ;;  %v1435_v55 = vsub.s32 %v1432_v28, %v1434_v31 }
 0x44f   : > { %1632 = vmatpush1.bf16.xpose.msra.mxu0 %v1631_v32 }
 0x450   : > { %v1436_v60 = vrot.slane %v1429_v29, %v1435_v55 }
 0x456   : > { %1335 = vmatmul.mubr.f32.vlgmr.msra.gmra.mrb[4].mxu0 %v327_v45 }
 0x529   : > { %v1336_v37 = vpop.f32.mrb[4].mxu0 }
 0x52a   : > { %v1338_v40 = vpop.f32.mrb[5].mxu0 }
 0x52b   : > { %1559 = vmatprep.subr.msk.mxu1 %vm249_vm0, %v1338_v40 }
 0x52c   : > { %1560 = vmatpush1.msk.msra.mxu1 %vm249_vm0, %v1336_v37 }
 0x52d   : > { %1561 = vmatmul.mubr.msk.f32.vlgmr.msra.gmra.mrb[64].mxu1 %vm242_vm1, %v228_v33 }
 0x600   : > { %v1416_v62 = vpop.f32.mrb[64].mxu1 }
 0x601   : > { %v1418_v54 = vpop.f32.mrb[65].mxu1 }
 0x602   : > { %v1423_v26 = vcombine.low %v1416_v62, %v1418_v54 }
 0x604   : > { %v1425_v38 = vadd.f32 %v1870_v41, %v1423_v26 }
 0x606   : > { %v1438_v57 = vadd.f32 %v1436_v60, %v1425_v38 }
 0x608   : > { %1439 = vst [vmem:[%s217_s9] sm:$0xff] %v1438_v57 }
 0x609   : > { %1884 = shalt.err (!%p1881_p3)
}
 0x60a   : > { %s1885_s23 = scalar_lea.hbm %s2667_s14, 128  ;;  %s1889_s30 = scalar_lea.hbm %s2714_s5, 256 }
 0x60b   : > { %p1886_p4 = scmp.ne.s32.totalorder %s2667_s14, %s1885_s23  ;;  %p1890_p9 = scmp.lt.u32.totalorder %s2667_s14, %s2714_s5 }
 0x60c   : > { %p1891_p10 = scmp.lt.u32.totalorder %s1889_s30, %s1885_s23  ;;  %p1893_p12 = scmp.lt.u32.totalorder %s1885_s23, %s2667_s14 }
 0x60d   : > { %p1887_p7 = pnand %p1886_p4, %p2007_p5 }
 0x60e   : > { %p1892_p11 = por %p1891_p10, %p1890_p9 }
 0x60f   : > { %p1888_p8 = pneg %p1887_p7 }
 0x610   : > { %p1894_p13 = por %p1893_p12, %p1892_p11 }
 0x612   : > { %p1895_p0 = pnand %p1894_p13, %p1888_p8 }
 0x614   : > { %1898 = shalt.err (!%p1895_p0)
}
 0x615   : > { %1633 = dma.vmem_to_hbm [thread:$0]  (%p2007_p5), %s2669_s10, 128, %s2667_s14, %s1441_s15  }
 0x616 PF: > { %p1639_p1 = scmp.ge.s32.totalorder %s1933_s21, 2  ;;  %s1467_s8 = sand.u32 1, %s1921_s18  }
 0x617   : > { %s1468_s9 = scalar_lea.sflag [#allocation3], %s1467_s8 }
 0x618   : > { %p1636_p2 = pnand %p1639_p1, %p2011_p6 }
 0x61a   : > { %1916 = dma.done.wait (!%p1636_p2), %s1468_s9, 128  }
 0x61b   : > { %1918 = vsyncadd (!%p1636_p2), %s1468_s9, 4294967168  ;;  %p15_p3 = scmp.ge.s32.totalorder %s1994_s24, 4   ;;  %s2809_s18 = smov %s1925_s19 }
 0x61c   : > { %s2810_s19 = smov %s1929_s20  ;;  %s2811_s20 = smov %s2005_s27 }
 0x61d   : > { %s2812_s21 = smov %s1994_s24  ;;  %17 = sbr.rel (!%p15_p3) target bundleno = 3 (0x3), region = 75 }
 0x624   :  { %1473 = vsyncpa [#allocation3], 1 }
 0x625   :  { %1475 = vsyncpa [#allocation3 + $0x1], 1 }

</bundles_post_ra>
